<compile_context>
chip_gen: v7x
topology: tpu7x:2x2x1
jax: 0.10.0
libtpu: 0.0.40
codegen_flags: <defaults>
</compile_context>

<pallas_src>
import jax
import jax.numpy as jnp
from jax.experimental import pallas as pl
from jax.experimental.pallas import tpu as pltpu

KH = KW = 3  # fixed 3x3 kernel


def _conv3x3_relu_kernel(w_ref, b_ref, x_ref, o_ref, pad_ref):
    # w_ref  : SMEM (C_out*C_in*9,)            flattened (co, ci, kh, kw) weights
    # b_ref  : SMEM (C_out,)                   bias
    # x_ref  : VMEM (B, C_in, H, W)            unpadded input block (B images)
    # o_ref  : VMEM (B, C_out, H, W)           output block
    # pad_ref: VMEM (C_in, B*(H+2)+2, W+2)     zero-padded, batch-stacked scratch
    B, c_in, H, W = x_ref.shape
    _, c_out, _, _ = o_ref.shape
    R = B * (H + 2)  # stacked row count of the accumulation plane

    # Build the zero halo once per grid step; interiors are overwritten below.
    pad_ref[...] = jnp.zeros_like(pad_ref)
    for ci in range(c_in):
        for b in range(B):
            r0 = b * (H + 2) + 1
            pad_ref[ci, r0:r0 + H, 1:1 + W] = x_ref[b, ci]

    # One accumulator plane per output channel, covering all B stacked images.
    accs = [jnp.full((R, W), b_ref[co], dtype=jnp.float32) for co in range(c_out)]

    for ci in range(c_in):
        # Hoist the 9 shifted windows for this input channel; reuse for all co.
        planes = [pad_ref[ci, kh:kh + R, kw:kw + W]
                  for kh in range(KH) for kw in range(KW)]
        for co in range(c_out):
            acc = accs[co]
            base = (co * c_in + ci) * (KH * KW)
            for k in range(KH * KW):
                acc = acc + w_ref[base + k] * planes[k]
            accs[co] = acc

    outs = [jnp.maximum(a, 0.0).astype(o_ref.dtype) for a in accs]
    for b in range(B):
        r0 = b * (H + 2)  # valid rows of image b inside the stacked plane
        for co in range(c_out):
            o_ref[b, co] = outs[co][r0:r0 + H, :]


def _pick_images_per_block(n, per_image_bytes, target_bytes=2 << 20):
    """Largest divisor of n whose block stays under target, keeping >=2 steps."""
    divisors = [d for d in range(1, n + 1) if n % d == 0]
    blk = 1
    for d in divisors:
        if d * per_image_bytes <= target_bytes:
            blk = d
    # Keep at least 2 grid steps when possible so v7x's 2 TensorCores both work.
    if n >= 2 and n // blk < 2:
        candidates = [d for d in divisors if n // d >= 2]
        if candidates:
            blk = max(candidates)
    return blk


def low_light_enhancement(x, weight, bias):
    """x: (N, 3, H, W) f32; weight: (3, 3, 3, 3) f32 (co, ci, kh, kw); bias: (3,) f32."""
    N, C_in, H, W = x.shape
    C_out = weight.shape[0]
    itemsize = jnp.dtype(x.dtype).itemsize

    # Per-image VMEM footprint estimate (in/out block + padded scratch + accs).
    per_image_bytes = (
        itemsize * (C_in + C_out) * H * W
        + 4 * (C_in * (H + 2) * (W + 2) + C_out * (H + 2) * W)
    )
    B = _pick_images_per_block(N, per_image_bytes)
    grid = (N // B,)
    R = B * (H + 2)

    in_block = B * C_in * H * W * itemsize
    out_block = B * C_out * H * W * itemsize
    scratch_bytes = C_in * (R + 2) * (W + 2) * 4
    acc_bytes = C_out * R * W * 4
    need = 2 * (in_block + out_block) + scratch_bytes + 4 * acc_bytes + (4 << 20)
    vmem_limit = int(min(48 << 20, max(32 << 20, 2 * need)))

    return pl.pallas_call(
        _conv3x3_relu_kernel,
        out_shape=jax.ShapeDtypeStruct((N, C_out, H, W), x.dtype),
        grid=grid,
        in_specs=[
            pl.BlockSpec(memory_space=pltpu.MemorySpace.SMEM),   # weights
            pl.BlockSpec(memory_space=pltpu.MemorySpace.SMEM),   # bias
            pl.BlockSpec((B, C_in, H, W), lambda n: (n, 0, 0, 0)),
        ],
        out_specs=pl.BlockSpec((B, C_out, H, W), lambda n: (n, 0, 0, 0)),
        scratch_shapes=[pltpu.VMEM((C_in, R + 2, W + 2), jnp.float32)],
        compiler_params=pltpu.CompilerParams(
            dimension_semantics=("parallel",),
            vmem_limit_bytes=vmem_limit,
        ),
    )(weight.reshape(-1).astype(jnp.float32), bias.astype(jnp.float32), x)


def reference(x, weight, bias):
    # Plain-JAX reference (conv + relu), NCHW / OIHW.
    y = jax.lax.conv_general_dilated(
        x, weight, window_strides=(1, 1), padding=((1, 1), (1, 1)),
        dimension_numbers=("NCHW", "OIHW", "NCHW"))
    return jnp.maximum(y + bias[None, :, None, None], 0.0)


if __name__ == "__main__":
    key = jax.random.PRNGKey(0)
    kx, kwt, kb = jax.random.split(key, 3)

    N, C, H, W = 2, 3, 16, 16
    x = jax.random.normal(kx, (N, C, H, W), dtype=jnp.float32)

    # Deterministic parameter init (PyTorch-style uniform(-1/sqrt(fan_in), +)).
    fan_in = C * KH * KW
    bound = 1.0 / (fan_in ** 0.5)
    weight = jax.random.uniform(kwt, (3, C, KH, KW), jnp.float32, -bound, bound)
    bias = jax.random.uniform(kb, (3,), jnp.float32, -bound, bound)

    out = jax.block_until_ready(low_light_enhancement(x, weight, bias))
    ref = jax.block_until_ready(reference(x, weight, bias))

    assert out.shape == (N, 3, H, W)
    assert jnp.allclose(out, ref, atol=1e-5, rtol=1e-5), float(
        jnp.max(jnp.abs(out - ref)))
    print("KERNEL_OK")
</pallas_src>

<mosaic_0001>
module attributes {stable_mosaic.version = 11 : i64} {
  func.func @_conv3x3_relu_kernel(%arg0: i32, %arg1: memref<81xf32, #tpu.memory_space<smem>>, %arg2: memref<3xf32, #tpu.memory_space<smem>>, %arg3: memref<1x3x16x16xf32, #tpu.memory_space<vmem>>, %arg4: memref<1x3x16x16xf32, #tpu.memory_space<vmem>>, %arg5: memref<3x20x18xf32, #tpu.memory_space<vmem>>) attributes {dimension_semantics = [#tpu.dimension_semantics<parallel>], iteration_bounds = array<i64: 2>, scalar_prefetch = 0 : i64, scratch_operands = 1 : i64, tpu.core_type = #tpu.core_type<tc>, window_params = [{transform_indices = @transform_0, window_bounds = array<i64: 81>}, {transform_indices = @transform_1, window_bounds = array<i64: 3>}, {transform_indices = @transform_2, window_bounds = array<i64: 1, 3, 16, 16>}, {transform_indices = @transform_3, window_bounds = array<i64: 1, 3, 16, 16>}]} {
    %cst = arith.constant 0.000000e+00 : f32
    %0 = vector.broadcast %cst : f32 to vector<3x20x18xf32>
    %c0 = arith.constant 0 : index
    %c0_0 = arith.constant 0 : index
    %c0_1 = arith.constant 0 : index
    %1 = vector.load %arg5[%c0, %c0_0, %c0_1] : memref<3x20x18xf32, #tpu.memory_space<vmem>>, vector<3x20x18xf32>
    tpu.vector_store %arg5[%c0, %c0_0, %c0_1], %0 {strides = array<i32>} : memref<3x20x18xf32, #tpu.memory_space<vmem>>, vector<3x20x18xf32>,
    %c0_2 = arith.constant 0 : index
    %c0_3 = arith.constant 0 : index
    %c0_4 = arith.constant 0 : index
    %c0_5 = arith.constant 0 : index
    %2 = vector.load %arg3[%c0_2, %c0_3, %c0_4, %c0_5] : memref<1x3x16x16xf32, #tpu.memory_space<vmem>>, vector<1x1x16x16xf32>
    %3 = vector.shape_cast %2 : vector<1x1x16x16xf32> to vector<16x16xf32>
    %c0_6 = arith.constant 0 : index
    %c1 = arith.constant 1 : index
    %c1_7 = arith.constant 1 : index
    %4 = vector.load %arg5[%c0_6, %c1, %c1_7] : memref<3x20x18xf32, #tpu.memory_space<vmem>>, vector<1x16x16xf32>
    %5 = vector.shape_cast %4 : vector<1x16x16xf32> to vector<16x16xf32>
    %6 = vector.shape_cast %3 : vector<16x16xf32> to vector<1x16x16xf32>
    tpu.vector_store %arg5[%c0_6, %c1, %c1_7], %6 {strides = array<i32>} : memref<3x20x18xf32, #tpu.memory_space<vmem>>, vector<1x16x16xf32>,
    %c0_8 = arith.constant 0 : index
    %c1_9 = arith.constant 1 : index
    %c0_10 = arith.constant 0 : index
    %c0_11 = arith.constant 0 : index
    %7 = vector.load %arg3[%c0_8, %c1_9, %c0_10, %c0_11] : memref<1x3x16x16xf32, #tpu.memory_space<vmem>>, vector<1x1x16x16xf32>
    %8 = vector.shape_cast %7 : vector<1x1x16x16xf32> to vector<16x16xf32>
    %c1_12 = arith.constant 1 : index
    %c1_13 = arith.constant 1 : index
    %c1_14 = arith.constant 1 : index
    %9 = vector.load %arg5[%c1_12, %c1_13, %c1_14] : memref<3x20x18xf32, #tpu.memory_space<vmem>>, vector<1x16x16xf32>
    %10 = vector.shape_cast %9 : vector<1x16x16xf32> to vector<16x16xf32>
    %11 = vector.shape_cast %8 : vector<16x16xf32> to vector<1x16x16xf32>
    tpu.vector_store %arg5[%c1_12, %c1_13, %c1_14], %11 {strides = array<i32>} : memref<3x20x18xf32, #tpu.memory_space<vmem>>, vector<1x16x16xf32>,
    %c0_15 = arith.constant 0 : index
    %c2 = arith.constant 2 : index
    %c0_16 = arith.constant 0 : index
    %c0_17 = arith.constant 0 : index
    %12 = vector.load %arg3[%c0_15, %c2, %c0_16, %c0_17] : memref<1x3x16x16xf32, #tpu.memory_space<vmem>>, vector<1x1x16x16xf32>
    %13 = vector.shape_cast %12 : vector<1x1x16x16xf32> to vector<16x16xf32>
    %c2_18 = arith.constant 2 : index
    %c1_19 = arith.constant 1 : index
    %c1_20 = arith.constant 1 : index
    %14 = vector.load %arg5[%c2_18, %c1_19, %c1_20] : memref<3x20x18xf32, #tpu.memory_space<vmem>>, vector<1x16x16xf32>
    %15 = vector.shape_cast %14 : vector<1x16x16xf32> to vector<16x16xf32>
    %16 = vector.shape_cast %13 : vector<16x16xf32> to vector<1x16x16xf32>
    tpu.vector_store %arg5[%c2_18, %c1_19, %c1_20], %16 {strides = array<i32>} : memref<3x20x18xf32, #tpu.memory_space<vmem>>, vector<1x16x16xf32>,
    %c0_21 = arith.constant 0 : index
    %17 = memref.load %arg2[%c0_21] : memref<3xf32, #tpu.memory_space<smem>>
    %18 = vector.broadcast %17 : f32 to vector<18x16xf32>
    %c1_22 = arith.constant 1 : index
    %19 = memref.load %arg2[%c1_22] : memref<3xf32, #tpu.memory_space<smem>>
    %20 = vector.broadcast %19 : f32 to vector<18x16xf32>
    %c2_23 = arith.constant 2 : index
    %21 = memref.load %arg2[%c2_23] : memref<3xf32, #tpu.memory_space<smem>>
    %22 = vector.broadcast %21 : f32 to vector<18x16xf32>
    %c0_24 = arith.constant 0 : index
    %c0_25 = arith.constant 0 : index
    %c0_26 = arith.constant 0 : index
    %23 = vector.load %arg5[%c0_24, %c0_25, %c0_26] : memref<3x20x18xf32, #tpu.memory_space<vmem>>, vector<1x18x16xf32>
    %24 = vector.shape_cast %23 : vector<1x18x16xf32> to vector<18x16xf32>
    %c0_27 = arith.constant 0 : index
    %c0_28 = arith.constant 0 : index
    %c1_29 = arith.constant 1 : index
    %25 = vector.load %arg5[%c0_27, %c0_28, %c1_29] : memref<3x20x18xf32, #tpu.memory_space<vmem>>, vector<1x18x16xf32>
    %26 = vector.shape_cast %25 : vector<1x18x16xf32> to vector<18x16xf32>
    %c0_30 = arith.constant 0 : index
    %c0_31 = arith.constant 0 : index
    %c2_32 = arith.constant 2 : index
    %27 = vector.load %arg5[%c0_30, %c0_31, %c2_32] : memref<3x20x18xf32, #tpu.memory_space<vmem>>, vector<1x18x16xf32>
    %28 = vector.shape_cast %27 : vector<1x18x16xf32> to vector<18x16xf32>
    %c0_33 = arith.constant 0 : index
    %c1_34 = arith.constant 1 : index
    %c0_35 = arith.constant 0 : index
    %29 = vector.load %arg5[%c0_33, %c1_34, %c0_35] : memref<3x20x18xf32, #tpu.memory_space<vmem>>, vector<1x18x16xf32>
    %30 = vector.shape_cast %29 : vector<1x18x16xf32> to vector<18x16xf32>
    %c0_36 = arith.constant 0 : index
    %c1_37 = arith.constant 1 : index
    %c1_38 = arith.constant 1 : index
    %31 = vector.load %arg5[%c0_36, %c1_37, %c1_38] : memref<3x20x18xf32, #tpu.memory_space<vmem>>, vector<1x18x16xf32>
    %32 = vector.shape_cast %31 : vector<1x18x16xf32> to vector<18x16xf32>
    %c0_39 = arith.constant 0 : index
    %c1_40 = arith.constant 1 : index
    %c2_41 = arith.constant 2 : index
    %33 = vector.load %arg5[%c0_39, %c1_40, %c2_41] : memref<3x20x18xf32, #tpu.memory_space<vmem>>, vector<1x18x16xf32>
    %34 = vector.shape_cast %33 : vector<1x18x16xf32> to vector<18x16xf32>
    %c0_42 = arith.constant 0 : index
    %c2_43 = arith.constant 2 : index
    %c0_44 = arith.constant 0 : index
    %35 = vector.load %arg5[%c0_42, %c2_43, %c0_44] : memref<3x20x18xf32, #tpu.memory_space<vmem>>, vector<1x18x16xf32>
    %36 = vector.shape_cast %35 : vector<1x18x16xf32> to vector<18x16xf32>
    %c0_45 = arith.constant 0 : index
    %c2_46 = arith.constant 2 : index
    %c1_47 = arith.constant 1 : index
    %37 = vector.load %arg5[%c0_45, %c2_46, %c1_47] : memref<3x20x18xf32, #tpu.memory_space<vmem>>, vector<1x18x16xf32>
    %38 = vector.shape_cast %37 : vector<1x18x16xf32> to vector<18x16xf32>
    %c0_48 = arith.constant 0 : index
    %c2_49 = arith.constant 2 : index
    %c2_50 = arith.constant 2 : index
    %39 = vector.load %arg5[%c0_48, %c2_49, %c2_50] : memref<3x20x18xf32, #tpu.memory_space<vmem>>, vector<1x18x16xf32>
    %40 = vector.shape_cast %39 : vector<1x18x16xf32> to vector<18x16xf32>
    %c0_51 = arith.constant 0 : index
    %41 = memref.load %arg1[%c0_51] : memref<81xf32, #tpu.memory_space<smem>>
    %42 = vector.broadcast %41 : f32 to vector<18x16xf32>
    %43 = arith.mulf %42, %24 : vector<18x16xf32>
    %44 = arith.addf %18, %43 : vector<18x16xf32>
    %c1_52 = arith.constant 1 : index
    %45 = memref.load %arg1[%c1_52] : memref<81xf32, #tpu.memory_space<smem>>
    %46 = vector.broadcast %45 : f32 to vector<18x16xf32>
    %47 = arith.mulf %46, %26 : vector<18x16xf32>
    %48 = arith.addf %44, %47 : vector<18x16xf32>
    %c2_53 = arith.constant 2 : index
    %49 = memref.load %arg1[%c2_53] : memref<81xf32, #tpu.memory_space<smem>>
    %50 = vector.broadcast %49 : f32 to vector<18x16xf32>
    %51 = arith.mulf %50, %28 : vector<18x16xf32>
    %52 = arith.addf %48, %51 : vector<18x16xf32>
    %c3 = arith.constant 3 : index
    %53 = memref.load %arg1[%c3] : memref<81xf32, #tpu.memory_space<smem>>
    %54 = vector.broadcast %53 : f32 to vector<18x16xf32>
    %55 = arith.mulf %54, %30 : vector<18x16xf32>
    %56 = arith.addf %52, %55 : vector<18x16xf32>
    %c4 = arith.constant 4 : index
    %57 = memref.load %arg1[%c4] : memref<81xf32, #tpu.memory_space<smem>>
    %58 = vector.broadcast %57 : f32 to vector<18x16xf32>
    %59 = arith.mulf %58, %32 : vector<18x16xf32>
    %60 = arith.addf %56, %59 : vector<18x16xf32>
    %c5 = arith.constant 5 : index
    %61 = memref.load %arg1[%c5] : memref<81xf32, #tpu.memory_space<smem>>
    %62 = vector.broadcast %61 : f32 to vector<18x16xf32>
    %63 = arith.mulf %62, %34 : vector<18x16xf32>
    %64 = arith.addf %60, %63 : vector<18x16xf32>
    %c6 = arith.constant 6 : index
    %65 = memref.load %arg1[%c6] : memref<81xf32, #tpu.memory_space<smem>>
    %66 = vector.broadcast %65 : f32 to vector<18x16xf32>
    %67 = arith.mulf %66, %36 : vector<18x16xf32>
    %68 = arith.addf %64, %67 : vector<18x16xf32>
    %c7 = arith.constant 7 : index
    %69 = memref.load %arg1[%c7] : memref<81xf32, #tpu.memory_space<smem>>
    %70 = vector.broadcast %69 : f32 to vector<18x16xf32>
    %71 = arith.mulf %70, %38 : vector<18x16xf32>
    %72 = arith.addf %68, %71 : vector<18x16xf32>
    %c8 = arith.constant 8 : index
    %73 = memref.load %arg1[%c8] : memref<81xf32, #tpu.memory_space<smem>>
    %74 = vector.broadcast %73 : f32 to vector<18x16xf32>
    %75 = arith.mulf %74, %40 : vector<18x16xf32>
    %76 = arith.addf %72, %75 : vector<18x16xf32>
    %c27 = arith.constant 27 : index
    %77 = memref.load %arg1[%c27] : memref<81xf32, #tpu.memory_space<smem>>
    %78 = vector.broadcast %77 : f32 to vector<18x16xf32>
    %79 = arith.mulf %78, %24 : vector<18x16xf32>
    %80 = arith.addf %20, %79 : vector<18x16xf32>
    %c28 = arith.constant 28 : index
    %81 = memref.load %arg1[%c28] : memref<81xf32, #tpu.memory_space<smem>>
    %82 = vector.broadcast %81 : f32 to vector<18x16xf32>
    %83 = arith.mulf %82, %26 : vector<18x16xf32>
    %84 = arith.addf %80, %83 : vector<18x16xf32>
    %c29 = arith.constant 29 : index
    %85 = memref.load %arg1[%c29] : memref<81xf32, #tpu.memory_space<smem>>
    %86 = vector.broadcast %85 : f32 to vector<18x16xf32>
    %87 = arith.mulf %86, %28 : vector<18x16xf32>
    %88 = arith.addf %84, %87 : vector<18x16xf32>
    %c30 = arith.constant 30 : index
    %89 = memref.load %arg1[%c30] : memref<81xf32, #tpu.memory_space<smem>>
    %90 = vector.broadcast %89 : f32 to vector<18x16xf32>
    %91 = arith.mulf %90, %30 : vector<18x16xf32>
    %92 = arith.addf %88, %91 : vector<18x16xf32>
    %c31 = arith.constant 31 : index
    %93 = memref.load %arg1[%c31] : memref<81xf32, #tpu.memory_space<smem>>
    %94 = vector.broadcast %93 : f32 to vector<18x16xf32>
    %95 = arith.mulf %94, %32 : vector<18x16xf32>
    %96 = arith.addf %92, %95 : vector<18x16xf32>
    %c32 = arith.constant 32 : index
    %97 = memref.load %arg1[%c32] : memref<81xf32, #tpu.memory_space<smem>>
    %98 = vector.broadcast %97 : f32 to vector<18x16xf32>
    %99 = arith.mulf %98, %34 : vector<18x16xf32>
    %100 = arith.addf %96, %99 : vector<18x16xf32>
    %c33 = arith.constant 33 : index
    %101 = memref.load %arg1[%c33] : memref<81xf32, #tpu.memory_space<smem>>
    %102 = vector.broadcast %101 : f32 to vector<18x16xf32>
    %103 = arith.mulf %102, %36 : vector<18x16xf32>
    %104 = arith.addf %100, %103 : vector<18x16xf32>
    %c34 = arith.constant 34 : index
    %105 = memref.load %arg1[%c34] : memref<81xf32, #tpu.memory_space<smem>>
    %106 = vector.broadcast %105 : f32 to vector<18x16xf32>
    %107 = arith.mulf %106, %38 : vector<18x16xf32>
    %108 = arith.addf %104, %107 : vector<18x16xf32>
    %c35 = arith.constant 35 : index
    %109 = memref.load %arg1[%c35] : memref<81xf32, #tpu.memory_space<smem>>
    %110 = vector.broadcast %109 : f32 to vector<18x16xf32>
    %111 = arith.mulf %110, %40 : vector<18x16xf32>
    %112 = arith.addf %108, %111 : vector<18x16xf32>
    %c54 = arith.constant 54 : index
    %113 = memref.load %arg1[%c54] : memref<81xf32, #tpu.memory_space<smem>>
    %114 = vector.broadcast %113 : f32 to vector<18x16xf32>
    %115 = arith.mulf %114, %24 : vector<18x16xf32>
    %116 = arith.addf %22, %115 : vector<18x16xf32>
    %c55 = arith.constant 55 : index
    %117 = memref.load %arg1[%c55] : memref<81xf32, #tpu.memory_space<smem>>
    %118 = vector.broadcast %117 : f32 to vector<18x16xf32>
    %119 = arith.mulf %118, %26 : vector<18x16xf32>
    %120 = arith.addf %116, %119 : vector<18x16xf32>
    %c56 = arith.constant 56 : index
    %121 = memref.load %arg1[%c56] : memref<81xf32, #tpu.memory_space<smem>>
    %122 = vector.broadcast %121 : f32 to vector<18x16xf32>
    %123 = arith.mulf %122, %28 : vector<18x16xf32>
    %124 = arith.addf %120, %123 : vector<18x16xf32>
    %c57 = arith.constant 57 : index
    %125 = memref.load %arg1[%c57] : memref<81xf32, #tpu.memory_space<smem>>
    %126 = vector.broadcast %125 : f32 to vector<18x16xf32>
    %127 = arith.mulf %126, %30 : vector<18x16xf32>
    %128 = arith.addf %124, %127 : vector<18x16xf32>
    %c58 = arith.constant 58 : index
    %129 = memref.load %arg1[%c58] : memref<81xf32, #tpu.memory_space<smem>>
    %130 = vector.broadcast %129 : f32 to vector<18x16xf32>
    %131 = arith.mulf %130, %32 : vector<18x16xf32>
    %132 = arith.addf %128, %131 : vector<18x16xf32>
    %c59 = arith.constant 59 : index
    %133 = memref.load %arg1[%c59] : memref<81xf32, #tpu.memory_space<smem>>
    %134 = vector.broadcast %133 : f32 to vector<18x16xf32>
    %135 = arith.mulf %134, %34 : vector<18x16xf32>
    %136 = arith.addf %132, %135 : vector<18x16xf32>
    %c60 = arith.constant 60 : index
    %137 = memref.load %arg1[%c60] : memref<81xf32, #tpu.memory_space<smem>>
    %138 = vector.broadcast %137 : f32 to vector<18x16xf32>
    %139 = arith.mulf %138, %36 : vector<18x16xf32>
    %140 = arith.addf %136, %139 : vector<18x16xf32>
    %c61 = arith.constant 61 : index
    %141 = memref.load %arg1[%c61] : memref<81xf32, #tpu.memory_space<smem>>
    %142 = vector.broadcast %141 : f32 to vector<18x16xf32>
    %143 = arith.mulf %142, %38 : vector<18x16xf32>
    %144 = arith.addf %140, %143 : vector<18x16xf32>
    %c62 = arith.constant 62 : index
    %145 = memref.load %arg1[%c62] : memref<81xf32, #tpu.memory_space<smem>>
    %146 = vector.broadcast %145 : f32 to vector<18x16xf32>
    %147 = arith.mulf %146, %40 : vector<18x16xf32>
    %148 = arith.addf %144, %147 : vector<18x16xf32>
    %c1_54 = arith.constant 1 : index
    %c0_55 = arith.constant 0 : index
    %c0_56 = arith.constant 0 : index
    %149 = vector.load %arg5[%c1_54, %c0_55, %c0_56] : memref<3x20x18xf32, #tpu.memory_space<vmem>>, vector<1x18x16xf32>
    %150 = vector.shape_cast %149 : vector<1x18x16xf32> to vector<18x16xf32>
    %c1_57 = arith.constant 1 : index
    %c0_58 = arith.constant 0 : index
    %c1_59 = arith.constant 1 : index
    %151 = vector.load %arg5[%c1_57, %c0_58, %c1_59] : memref<3x20x18xf32, #tpu.memory_space<vmem>>, vector<1x18x16xf32>
    %152 = vector.shape_cast %151 : vector<1x18x16xf32> to vector<18x16xf32>
    %c1_60 = arith.constant 1 : index
    %c0_61 = arith.constant 0 : index
    %c2_62 = arith.constant 2 : index
    %153 = vector.load %arg5[%c1_60, %c0_61, %c2_62] : memref<3x20x18xf32, #tpu.memory_space<vmem>>, vector<1x18x16xf32>
    %154 = vector.shape_cast %153 : vector<1x18x16xf32> to vector<18x16xf32>
    %c1_63 = arith.constant 1 : index
    %c1_64 = arith.constant 1 : index
    %c0_65 = arith.constant 0 : index
    %155 = vector.load %arg5[%c1_63, %c1_64, %c0_65] : memref<3x20x18xf32, #tpu.memory_space<vmem>>, vector<1x18x16xf32>
    %156 = vector.shape_cast %155 : vector<1x18x16xf32> to vector<18x16xf32>
    %c1_66 = arith.constant 1 : index
    %c1_67 = arith.constant 1 : index
    %c1_68 = arith.constant 1 : index
    %157 = vector.load %arg5[%c1_66, %c1_67, %c1_68] : memref<3x20x18xf32, #tpu.memory_space<vmem>>, vector<1x18x16xf32>
    %158 = vector.shape_cast %157 : vector<1x18x16xf32> to vector<18x16xf32>
    %c1_69 = arith.constant 1 : index
    %c1_70 = arith.constant 1 : index
    %c2_71 = arith.constant 2 : index
    %159 = vector.load %arg5[%c1_69, %c1_70, %c2_71] : memref<3x20x18xf32, #tpu.memory_space<vmem>>, vector<1x18x16xf32>
    %160 = vector.shape_cast %159 : vector<1x18x16xf32> to vector<18x16xf32>
    %c1_72 = arith.constant 1 : index
    %c2_73 = arith.constant 2 : index
    %c0_74 = arith.constant 0 : index
    %161 = vector.load %arg5[%c1_72, %c2_73, %c0_74] : memref<3x20x18xf32, #tpu.memory_space<vmem>>, vector<1x18x16xf32>
    %162 = vector.shape_cast %161 : vector<1x18x16xf32> to vector<18x16xf32>
    %c1_75 = arith.constant 1 : index
    %c2_76 = arith.constant 2 : index
    %c1_77 = arith.constant 1 : index
    %163 = vector.load %arg5[%c1_75, %c2_76, %c1_77] : memref<3x20x18xf32, #tpu.memory_space<vmem>>, vector<1x18x16xf32>
    %164 = vector.shape_cast %163 : vector<1x18x16xf32> to vector<18x16xf32>
    %c1_78 = arith.constant 1 : index
    %c2_79 = arith.constant 2 : index
    %c2_80 = arith.constant 2 : index
    %165 = vector.load %arg5[%c1_78, %c2_79, %c2_80] : memref<3x20x18xf32, #tpu.memory_space<vmem>>, vector<1x18x16xf32>
    %166 = vector.shape_cast %165 : vector<1x18x16xf32> to vector<18x16xf32>
    %c9 = arith.constant 9 : index
    %167 = memref.load %arg1[%c9] : memref<81xf32, #tpu.memory_space<smem>>
    %168 = vector.broadcast %167 : f32 to vector<18x16xf32>
    %169 = arith.mulf %168, %150 : vector<18x16xf32>
    %170 = arith.addf %76, %169 : vector<18x16xf32>
    %c10 = arith.constant 10 : index
    %171 = memref.load %arg1[%c10] : memref<81xf32, #tpu.memory_space<smem>>
    %172 = vector.broadcast %171 : f32 to vector<18x16xf32>
    %173 = arith.mulf %172, %152 : vector<18x16xf32>
    %174 = arith.addf %170, %173 : vector<18x16xf32>
    %c11 = arith.constant 11 : index
    %175 = memref.load %arg1[%c11] : memref<81xf32, #tpu.memory_space<smem>>
    %176 = vector.broadcast %175 : f32 to vector<18x16xf32>
    %177 = arith.mulf %176, %154 : vector<18x16xf32>
    %178 = arith.addf %174, %177 : vector<18x16xf32>
    %c12 = arith.constant 12 : index
    %179 = memref.load %arg1[%c12] : memref<81xf32, #tpu.memory_space<smem>>
    %180 = vector.broadcast %179 : f32 to vector<18x16xf32>
    %181 = arith.mulf %180, %156 : vector<18x16xf32>
    %182 = arith.addf %178, %181 : vector<18x16xf32>
    %c13 = arith.constant 13 : index
    %183 = memref.load %arg1[%c13] : memref<81xf32, #tpu.memory_space<smem>>
    %184 = vector.broadcast %183 : f32 to vector<18x16xf32>
    %185 = arith.mulf %184, %158 : vector<18x16xf32>
    %186 = arith.addf %182, %185 : vector<18x16xf32>
    %c14 = arith.constant 14 : index
    %187 = memref.load %arg1[%c14] : memref<81xf32, #tpu.memory_space<smem>>
    %188 = vector.broadcast %187 : f32 to vector<18x16xf32>
    %189 = arith.mulf %188, %160 : vector<18x16xf32>
    %190 = arith.addf %186, %189 : vector<18x16xf32>
    %c15 = arith.constant 15 : index
    %191 = memref.load %arg1[%c15] : memref<81xf32, #tpu.memory_space<smem>>
    %192 = vector.broadcast %191 : f32 to vector<18x16xf32>
    %193 = arith.mulf %192, %162 : vector<18x16xf32>
    %194 = arith.addf %190, %193 : vector<18x16xf32>
    %c16 = arith.constant 16 : index
    %195 = memref.load %arg1[%c16] : memref<81xf32, #tpu.memory_space<smem>>
    %196 = vector.broadcast %195 : f32 to vector<18x16xf32>
    %197 = arith.mulf %196, %164 : vector<18x16xf32>
    %198 = arith.addf %194, %197 : vector<18x16xf32>
    %c17 = arith.constant 17 : index
    %199 = memref.load %arg1[%c17] : memref<81xf32, #tpu.memory_space<smem>>
    %200 = vector.broadcast %199 : f32 to vector<18x16xf32>
    %201 = arith.mulf %200, %166 : vector<18x16xf32>
    %202 = arith.addf %198, %201 : vector<18x16xf32>
    %c36 = arith.constant 36 : index
    %203 = memref.load %arg1[%c36] : memref<81xf32, #tpu.memory_space<smem>>
    %204 = vector.broadcast %203 : f32 to vector<18x16xf32>
    %205 = arith.mulf %204, %150 : vector<18x16xf32>
    %206 = arith.addf %112, %205 : vector<18x16xf32>
    %c37 = arith.constant 37 : index
    %207 = memref.load %arg1[%c37] : memref<81xf32, #tpu.memory_space<smem>>
    %208 = vector.broadcast %207 : f32 to vector<18x16xf32>
    %209 = arith.mulf %208, %152 : vector<18x16xf32>
    %210 = arith.addf %206, %209 : vector<18x16xf32>
    %c38 = arith.constant 38 : index
    %211 = memref.load %arg1[%c38] : memref<81xf32, #tpu.memory_space<smem>>
    %212 = vector.broadcast %211 : f32 to vector<18x16xf32>
    %213 = arith.mulf %212, %154 : vector<18x16xf32>
    %214 = arith.addf %210, %213 : vector<18x16xf32>
    %c39 = arith.constant 39 : index
    %215 = memref.load %arg1[%c39] : memref<81xf32, #tpu.memory_space<smem>>
    %216 = vector.broadcast %215 : f32 to vector<18x16xf32>
    %217 = arith.mulf %216, %156 : vector<18x16xf32>
    %218 = arith.addf %214, %217 : vector<18x16xf32>
    %c40 = arith.constant 40 : index
    %219 = memref.load %arg1[%c40] : memref<81xf32, #tpu.memory_space<smem>>
    %220 = vector.broadcast %219 : f32 to vector<18x16xf32>
    %221 = arith.mulf %220, %158 : vector<18x16xf32>
    %222 = arith.addf %218, %221 : vector<18x16xf32>
    %c41 = arith.constant 41 : index
    %223 = memref.load %arg1[%c41] : memref<81xf32, #tpu.memory_space<smem>>
    %224 = vector.broadcast %223 : f32 to vector<18x16xf32>
    %225 = arith.mulf %224, %160 : vector<18x16xf32>
    %226 = arith.addf %222, %225 : vector<18x16xf32>
    %c42 = arith.constant 42 : index
    %227 = memref.load %arg1[%c42] : memref<81xf32, #tpu.memory_space<smem>>
    %228 = vector.broadcast %227 : f32 to vector<18x16xf32>
    %229 = arith.mulf %228, %162 : vector<18x16xf32>
    %230 = arith.addf %226, %229 : vector<18x16xf32>
    %c43 = arith.constant 43 : index
    %231 = memref.load %arg1[%c43] : memref<81xf32, #tpu.memory_space<smem>>
    %232 = vector.broadcast %231 : f32 to vector<18x16xf32>
    %233 = arith.mulf %232, %164 : vector<18x16xf32>
    %234 = arith.addf %230, %233 : vector<18x16xf32>
    %c44 = arith.constant 44 : index
    %235 = memref.load %arg1[%c44] : memref<81xf32, #tpu.memory_space<smem>>
    %236 = vector.broadcast %235 : f32 to vector<18x16xf32>
    %237 = arith.mulf %236, %166 : vector<18x16xf32>
    %238 = arith.addf %234, %237 : vector<18x16xf32>
    %c63 = arith.constant 63 : index
    %239 = memref.load %arg1[%c63] : memref<81xf32, #tpu.memory_space<smem>>
    %240 = vector.broadcast %239 : f32 to vector<18x16xf32>
    %241 = arith.mulf %240, %150 : vector<18x16xf32>
    %242 = arith.addf %148, %241 : vector<18x16xf32>
    %c64 = arith.constant 64 : index
    %243 = memref.load %arg1[%c64] : memref<81xf32, #tpu.memory_space<smem>>
    %244 = vector.broadcast %243 : f32 to vector<18x16xf32>
    %245 = arith.mulf %244, %152 : vector<18x16xf32>
    %246 = arith.addf %242, %245 : vector<18x16xf32>
    %c65 = arith.constant 65 : index
    %247 = memref.load %arg1[%c65] : memref<81xf32, #tpu.memory_space<smem>>
    %248 = vector.broadcast %247 : f32 to vector<18x16xf32>
    %249 = arith.mulf %248, %154 : vector<18x16xf32>
    %250 = arith.addf %246, %249 : vector<18x16xf32>
    %c66 = arith.constant 66 : index
    %251 = memref.load %arg1[%c66] : memref<81xf32, #tpu.memory_space<smem>>
    %252 = vector.broadcast %251 : f32 to vector<18x16xf32>
    %253 = arith.mulf %252, %156 : vector<18x16xf32>
    %254 = arith.addf %250, %253 : vector<18x16xf32>
    %c67 = arith.constant 67 : index
    %255 = memref.load %arg1[%c67] : memref<81xf32, #tpu.memory_space<smem>>
    %256 = vector.broadcast %255 : f32 to vector<18x16xf32>
    %257 = arith.mulf %256, %158 : vector<18x16xf32>
    %258 = arith.addf %254, %257 : vector<18x16xf32>
    %c68 = arith.constant 68 : index
    %259 = memref.load %arg1[%c68] : memref<81xf32, #tpu.memory_space<smem>>
    %260 = vector.broadcast %259 : f32 to vector<18x16xf32>
    %261 = arith.mulf %260, %160 : vector<18x16xf32>
    %262 = arith.addf %258, %261 : vector<18x16xf32>
    %c69 = arith.constant 69 : index
    %263 = memref.load %arg1[%c69] : memref<81xf32, #tpu.memory_space<smem>>
    %264 = vector.broadcast %263 : f32 to vector<18x16xf32>
    %265 = arith.mulf %264, %162 : vector<18x16xf32>
    %266 = arith.addf %262, %265 : vector<18x16xf32>
    %c70 = arith.constant 70 : index
    %267 = memref.load %arg1[%c70] : memref<81xf32, #tpu.memory_space<smem>>
    %268 = vector.broadcast %267 : f32 to vector<18x16xf32>
    %269 = arith.mulf %268, %164 : vector<18x16xf32>
    %270 = arith.addf %266, %269 : vector<18x16xf32>
    %c71 = arith.constant 71 : index
    %271 = memref.load %arg1[%c71] : memref<81xf32, #tpu.memory_space<smem>>
    %272 = vector.broadcast %271 : f32 to vector<18x16xf32>
    %273 = arith.mulf %272, %166 : vector<18x16xf32>
    %274 = arith.addf %270, %273 : vector<18x16xf32>
    %c2_81 = arith.constant 2 : index
    %c0_82 = arith.constant 0 : index
    %c0_83 = arith.constant 0 : index
    %275 = vector.load %arg5[%c2_81, %c0_82, %c0_83] : memref<3x20x18xf32, #tpu.memory_space<vmem>>, vector<1x18x16xf32>
    %276 = vector.shape_cast %275 : vector<1x18x16xf32> to vector<18x16xf32>
    %c2_84 = arith.constant 2 : index
    %c0_85 = arith.constant 0 : index
    %c1_86 = arith.constant 1 : index
    %277 = vector.load %arg5[%c2_84, %c0_85, %c1_86] : memref<3x20x18xf32, #tpu.memory_space<vmem>>, vector<1x18x16xf32>
    %278 = vector.shape_cast %277 : vector<1x18x16xf32> to vector<18x16xf32>
    %c2_87 = arith.constant 2 : index
    %c0_88 = arith.constant 0 : index
    %c2_89 = arith.constant 2 : index
    %279 = vector.load %arg5[%c2_87, %c0_88, %c2_89] : memref<3x20x18xf32, #tpu.memory_space<vmem>>, vector<1x18x16xf32>
    %280 = vector.shape_cast %279 : vector<1x18x16xf32> to vector<18x16xf32>
    %c2_90 = arith.constant 2 : index
    %c1_91 = arith.constant 1 : index
    %c0_92 = arith.constant 0 : index
    %281 = vector.load %arg5[%c2_90, %c1_91, %c0_92] : memref<3x20x18xf32, #tpu.memory_space<vmem>>, vector<1x18x16xf32>
    %282 = vector.shape_cast %281 : vector<1x18x16xf32> to vector<18x16xf32>
    %c2_93 = arith.constant 2 : index
    %c1_94 = arith.constant 1 : index
    %c1_95 = arith.constant 1 : index
    %283 = vector.load %arg5[%c2_93, %c1_94, %c1_95] : memref<3x20x18xf32, #tpu.memory_space<vmem>>, vector<1x18x16xf32>
    %284 = vector.shape_cast %283 : vector<1x18x16xf32> to vector<18x16xf32>
    %c2_96 = arith.constant 2 : index
    %c1_97 = arith.constant 1 : index
    %c2_98 = arith.constant 2 : index
    %285 = vector.load %arg5[%c2_96, %c1_97, %c2_98] : memref<3x20x18xf32, #tpu.memory_space<vmem>>, vector<1x18x16xf32>
    %286 = vector.shape_cast %285 : vector<1x18x16xf32> to vector<18x16xf32>
    %c2_99 = arith.constant 2 : index
    %c2_100 = arith.constant 2 : index
    %c0_101 = arith.constant 0 : index
    %287 = vector.load %arg5[%c2_99, %c2_100, %c0_101] : memref<3x20x18xf32, #tpu.memory_space<vmem>>, vector<1x18x16xf32>
    %288 = vector.shape_cast %287 : vector<1x18x16xf32> to vector<18x16xf32>
    %c2_102 = arith.constant 2 : index
    %c2_103 = arith.constant 2 : index
    %c1_104 = arith.constant 1 : index
    %289 = vector.load %arg5[%c2_102, %c2_103, %c1_104] : memref<3x20x18xf32, #tpu.memory_space<vmem>>, vector<1x18x16xf32>
    %290 = vector.shape_cast %289 : vector<1x18x16xf32> to vector<18x16xf32>
    %c2_105 = arith.constant 2 : index
    %c2_106 = arith.constant 2 : index
    %c2_107 = arith.constant 2 : index
    %291 = vector.load %arg5[%c2_105, %c2_106, %c2_107] : memref<3x20x18xf32, #tpu.memory_space<vmem>>, vector<1x18x16xf32>
    %292 = vector.shape_cast %291 : vector<1x18x16xf32> to vector<18x16xf32>
    %c18 = arith.constant 18 : index
    %293 = memref.load %arg1[%c18] : memref<81xf32, #tpu.memory_space<smem>>
    %294 = vector.broadcast %293 : f32 to vector<18x16xf32>
    %295 = arith.mulf %294, %276 : vector<18x16xf32>
    %296 = arith.addf %202, %295 : vector<18x16xf32>
    %c19 = arith.constant 19 : index
    %297 = memref.load %arg1[%c19] : memref<81xf32, #tpu.memory_space<smem>>
    %298 = vector.broadcast %297 : f32 to vector<18x16xf32>
    %299 = arith.mulf %298, %278 : vector<18x16xf32>
    %300 = arith.addf %296, %299 : vector<18x16xf32>
    %c20 = arith.constant 20 : index
    %301 = memref.load %arg1[%c20] : memref<81xf32, #tpu.memory_space<smem>>
    %302 = vector.broadcast %301 : f32 to vector<18x16xf32>
    %303 = arith.mulf %302, %280 : vector<18x16xf32>
    %304 = arith.addf %300, %303 : vector<18x16xf32>
    %c21 = arith.constant 21 : index
    %305 = memref.load %arg1[%c21] : memref<81xf32, #tpu.memory_space<smem>>
    %306 = vector.broadcast %305 : f32 to vector<18x16xf32>
    %307 = arith.mulf %306, %282 : vector<18x16xf32>
    %308 = arith.addf %304, %307 : vector<18x16xf32>
    %c22 = arith.constant 22 : index
    %309 = memref.load %arg1[%c22] : memref<81xf32, #tpu.memory_space<smem>>
    %310 = vector.broadcast %309 : f32 to vector<18x16xf32>
    %311 = arith.mulf %310, %284 : vector<18x16xf32>
    %312 = arith.addf %308, %311 : vector<18x16xf32>
    %c23 = arith.constant 23 : index
    %313 = memref.load %arg1[%c23] : memref<81xf32, #tpu.memory_space<smem>>
    %314 = vector.broadcast %313 : f32 to vector<18x16xf32>
    %315 = arith.mulf %314, %286 : vector<18x16xf32>
    %316 = arith.addf %312, %315 : vector<18x16xf32>
    %c24 = arith.constant 24 : index
    %317 = memref.load %arg1[%c24] : memref<81xf32, #tpu.memory_space<smem>>
    %318 = vector.broadcast %317 : f32 to vector<18x16xf32>
    %319 = arith.mulf %318, %288 : vector<18x16xf32>
    %320 = arith.addf %316, %319 : vector<18x16xf32>
    %c25 = arith.constant 25 : index
    %321 = memref.load %arg1[%c25] : memref<81xf32, #tpu.memory_space<smem>>
    %322 = vector.broadcast %321 : f32 to vector<18x16xf32>
    %323 = arith.mulf %322, %290 : vector<18x16xf32>
    %324 = arith.addf %320, %323 : vector<18x16xf32>
    %c26 = arith.constant 26 : index
    %325 = memref.load %arg1[%c26] : memref<81xf32, #tpu.memory_space<smem>>
    %326 = vector.broadcast %325 : f32 to vector<18x16xf32>
    %327 = arith.mulf %326, %292 : vector<18x16xf32>
    %328 = arith.addf %324, %327 : vector<18x16xf32>
    %c45 = arith.constant 45 : index
    %329 = memref.load %arg1[%c45] : memref<81xf32, #tpu.memory_space<smem>>
    %330 = vector.broadcast %329 : f32 to vector<18x16xf32>
    %331 = arith.mulf %330, %276 : vector<18x16xf32>
    %332 = arith.addf %238, %331 : vector<18x16xf32>
    %c46 = arith.constant 46 : index
    %333 = memref.load %arg1[%c46] : memref<81xf32, #tpu.memory_space<smem>>
    %334 = vector.broadcast %333 : f32 to vector<18x16xf32>
    %335 = arith.mulf %334, %278 : vector<18x16xf32>
    %336 = arith.addf %332, %335 : vector<18x16xf32>
    %c47 = arith.constant 47 : index
    %337 = memref.load %arg1[%c47] : memref<81xf32, #tpu.memory_space<smem>>
    %338 = vector.broadcast %337 : f32 to vector<18x16xf32>
    %339 = arith.mulf %338, %280 : vector<18x16xf32>
    %340 = arith.addf %336, %339 : vector<18x16xf32>
    %c48 = arith.constant 48 : index
    %341 = memref.load %arg1[%c48] : memref<81xf32, #tpu.memory_space<smem>>
    %342 = vector.broadcast %341 : f32 to vector<18x16xf32>
    %343 = arith.mulf %342, %282 : vector<18x16xf32>
    %344 = arith.addf %340, %343 : vector<18x16xf32>
    %c49 = arith.constant 49 : index
    %345 = memref.load %arg1[%c49] : memref<81xf32, #tpu.memory_space<smem>>
    %346 = vector.broadcast %345 : f32 to vector<18x16xf32>
    %347 = arith.mulf %346, %284 : vector<18x16xf32>
    %348 = arith.addf %344, %347 : vector<18x16xf32>
    %c50 = arith.constant 50 : index
    %349 = memref.load %arg1[%c50] : memref<81xf32, #tpu.memory_space<smem>>
    %350 = vector.broadcast %349 : f32 to vector<18x16xf32>
    %351 = arith.mulf %350, %286 : vector<18x16xf32>
    %352 = arith.addf %348, %351 : vector<18x16xf32>
    %c51 = arith.constant 51 : index
    %353 = memref.load %arg1[%c51] : memref<81xf32, #tpu.memory_space<smem>>
    %354 = vector.broadcast %353 : f32 to vector<18x16xf32>
    %355 = arith.mulf %354, %288 : vector<18x16xf32>
    %356 = arith.addf %352, %355 : vector<18x16xf32>
    %c52 = arith.constant 52 : index
    %357 = memref.load %arg1[%c52] : memref<81xf32, #tpu.memory_space<smem>>
    %358 = vector.broadcast %357 : f32 to vector<18x16xf32>
    %359 = arith.mulf %358, %290 : vector<18x16xf32>
    %360 = arith.addf %356, %359 : vector<18x16xf32>
    %c53 = arith.constant 53 : index
    %361 = memref.load %arg1[%c53] : memref<81xf32, #tpu.memory_space<smem>>
    %362 = vector.broadcast %361 : f32 to vector<18x16xf32>
    %363 = arith.mulf %362, %292 : vector<18x16xf32>
    %364 = arith.addf %360, %363 : vector<18x16xf32>
    %c72 = arith.constant 72 : index
    %365 = memref.load %arg1[%c72] : memref<81xf32, #tpu.memory_space<smem>>
    %366 = vector.broadcast %365 : f32 to vector<18x16xf32>
    %367 = arith.mulf %366, %276 : vector<18x16xf32>
    %368 = arith.addf %274, %367 : vector<18x16xf32>
    %c73 = arith.constant 73 : index
    %369 = memref.load %arg1[%c73] : memref<81xf32, #tpu.memory_space<smem>>
    %370 = vector.broadcast %369 : f32 to vector<18x16xf32>
    %371 = arith.mulf %370, %278 : vector<18x16xf32>
    %372 = arith.addf %368, %371 : vector<18x16xf32>
    %c74 = arith.constant 74 : index
    %373 = memref.load %arg1[%c74] : memref<81xf32, #tpu.memory_space<smem>>
    %374 = vector.broadcast %373 : f32 to vector<18x16xf32>
    %375 = arith.mulf %374, %280 : vector<18x16xf32>
    %376 = arith.addf %372, %375 : vector<18x16xf32>
    %c75 = arith.constant 75 : index
    %377 = memref.load %arg1[%c75] : memref<81xf32, #tpu.memory_space<smem>>
    %378 = vector.broadcast %377 : f32 to vector<18x16xf32>
    %379 = arith.mulf %378, %282 : vector<18x16xf32>
    %380 = arith.addf %376, %379 : vector<18x16xf32>
    %c76 = arith.constant 76 : index
    %381 = memref.load %arg1[%c76] : memref<81xf32, #tpu.memory_space<smem>>
    %382 = vector.broadcast %381 : f32 to vector<18x16xf32>
    %383 = arith.mulf %382, %284 : vector<18x16xf32>
    %384 = arith.addf %380, %383 : vector<18x16xf32>
    %c77 = arith.constant 77 : index
    %385 = memref.load %arg1[%c77] : memref<81xf32, #tpu.memory_space<smem>>
    %386 = vector.broadcast %385 : f32 to vector<18x16xf32>
    %387 = arith.mulf %386, %286 : vector<18x16xf32>
    %388 = arith.addf %384, %387 : vector<18x16xf32>
    %c78 = arith.constant 78 : index
    %389 = memref.load %arg1[%c78] : memref<81xf32, #tpu.memory_space<smem>>
    %390 = vector.broadcast %389 : f32 to vector<18x16xf32>
    %391 = arith.mulf %390, %288 : vector<18x16xf32>
    %392 = arith.addf %388, %391 : vector<18x16xf32>
    %c79 = arith.constant 79 : index
    %393 = memref.load %arg1[%c79] : memref<81xf32, #tpu.memory_space<smem>>
    %394 = vector.broadcast %393 : f32 to vector<18x16xf32>
    %395 = arith.mulf %394, %290 : vector<18x16xf32>
    %396 = arith.addf %392, %395 : vector<18x16xf32>
    %c80 = arith.constant 80 : index
    %397 = memref.load %arg1[%c80] : memref<81xf32, #tpu.memory_space<smem>>
    %398 = vector.broadcast %397 : f32 to vector<18x16xf32>
    %399 = arith.mulf %398, %292 : vector<18x16xf32>
    %400 = arith.addf %396, %399 : vector<18x16xf32>
    %cst_108 = arith.constant 0.000000e+00 : f32
    %401 = vector.broadcast %cst_108 : f32 to vector<18x16xf32>
    %402 = arith.maximumf %328, %401 : vector<18x16xf32>
    %cst_109 = arith.constant 0.000000e+00 : f32
    %403 = vector.broadcast %cst_109 : f32 to vector<18x16xf32>
    %404 = arith.maximumf %364, %403 : vector<18x16xf32>
    %cst_110 = arith.constant 0.000000e+00 : f32
    %405 = vector.broadcast %cst_110 : f32 to vector<18x16xf32>
    %406 = arith.maximumf %400, %405 : vector<18x16xf32>
    %407 = vector.extract_strided_slice %402 {offsets = [0, 0], sizes = [16, 16], strides = [1, 1]} : vector<18x16xf32> to vector<16x16xf32>
    %c0_111 = arith.constant 0 : index
    %c0_112 = arith.constant 0 : index
    %c0_113 = arith.constant 0 : index
    %c0_114 = arith.constant 0 : index
    %408 = vector.load %arg4[%c0_111, %c0_112, %c0_113, %c0_114] : memref<1x3x16x16xf32, #tpu.memory_space<vmem>>, vector<1x1x16x16xf32>
    %409 = vector.shape_cast %408 : vector<1x1x16x16xf32> to vector<16x16xf32>
    %410 = vector.shape_cast %407 : vector<16x16xf32> to vector<1x1x16x16xf32>
    tpu.vector_store %arg4[%c0_111, %c0_112, %c0_113, %c0_114], %410 {strides = array<i32>} : memref<1x3x16x16xf32, #tpu.memory_space<vmem>>, vector<1x1x16x16xf32>,
    %411 = vector.extract_strided_slice %404 {offsets = [0, 0], sizes = [16, 16], strides = [1, 1]} : vector<18x16xf32> to vector<16x16xf32>
    %c0_115 = arith.constant 0 : index
    %c1_116 = arith.constant 1 : index
    %c0_117 = arith.constant 0 : index
    %c0_118 = arith.constant 0 : index
    %412 = vector.load %arg4[%c0_115, %c1_116, %c0_117, %c0_118] : memref<1x3x16x16xf32, #tpu.memory_space<vmem>>, vector<1x1x16x16xf32>
    %413 = vector.shape_cast %412 : vector<1x1x16x16xf32> to vector<16x16xf32>
    %414 = vector.shape_cast %411 : vector<16x16xf32> to vector<1x1x16x16xf32>
    tpu.vector_store %arg4[%c0_115, %c1_116, %c0_117, %c0_118], %414 {strides = array<i32>} : memref<1x3x16x16xf32, #tpu.memory_space<vmem>>, vector<1x1x16x16xf32>,
    %415 = vector.extract_strided_slice %406 {offsets = [0, 0], sizes = [16, 16], strides = [1, 1]} : vector<18x16xf32> to vector<16x16xf32>
    %c0_119 = arith.constant 0 : index
    %c2_120 = arith.constant 2 : index
    %c0_121 = arith.constant 0 : index
    %c0_122 = arith.constant 0 : index
    %416 = vector.load %arg4[%c0_119, %c2_120, %c0_121, %c0_122] : memref<1x3x16x16xf32, #tpu.memory_space<vmem>>, vector<1x1x16x16xf32>
    %417 = vector.shape_cast %416 : vector<1x1x16x16xf32> to vector<16x16xf32>
    %418 = vector.shape_cast %415 : vector<16x16xf32> to vector<1x1x16x16xf32>
    tpu.vector_store %arg4[%c0_119, %c2_120, %c0_121, %c0_122], %418 {strides = array<i32>} : memref<1x3x16x16xf32, #tpu.memory_space<vmem>>, vector<1x1x16x16xf32>,
    return
  }
  func.func @transform_0(%arg0: i32) -> i32 {
    %c0_i32 = arith.constant 0 : i32
    %c0_i32_0 = arith.constant 0 : i32
    return %c0_i32 : i32
  }
  func.func @transform_1(%arg0: i32) -> i32 {
    %c0_i32 = arith.constant 0 : i32
    %c0_i32_0 = arith.constant 0 : i32
    return %c0_i32 : i32
  }
  func.func @transform_2(%arg0: i32) -> (i32, i32, i32, i32) {
    %c0_i32 = arith.constant 0 : i32
    %c0_i32_0 = arith.constant 0 : i32
    %c0_i32_1 = arith.constant 0 : i32
    %c0_i32_2 = arith.constant 0 : i32
    return %arg0, %c0_i32, %c0_i32_0, %c0_i32_1 : i32, i32, i32, i32
  }
  func.func @transform_3(%arg0: i32) -> (i32, i32, i32, i32) {
    %c0_i32 = arith.constant 0 : i32
    %c0_i32_0 = arith.constant 0 : i32
    %c0_i32_1 = arith.constant 0 : i32
    %c0_i32_2 = arith.constant 0 : i32
    return %arg0, %c0_i32, %c0_i32_0, %c0_i32_1 : i32, i32, i32, i32
  }
}

</mosaic_0001>

<bundles_post_ra>
// kernel: tpu_custom_call.1
= control target key start
LH: loop header
LB: loop body
LE: loop exit
PB: predicated region body
PF: predicated region fallthrough
CT: control target
= control target key end

     0   :  { %8 = vsyncpa [#allocation6], 0  ;;  %s2372_s0 = inlined_call_operand.hbm [shape: f32[81], index: 0, kind: input, shape index: {}]   ;;  %s2373_s1 = inlined_call_operand.vmem [shape: f32[3], index: 1, kind: input, shape index: {}]   ;;  %s2374_s2 = inlined_call_operand.hbm [shape: f32[2,3,16,16], index: 2, kind: input, shape index: {}]   ;;  %s2375_s3 = inlined_call_operand.hbm [shape: f32[2,3,16,16], index: 3, kind: output, shape index: {}]  }
   0x1   :  { %9 = vsyncpa [#allocation7], 0 }
   0x2   :  { %10 = vsyncpa [#allocation4], 0 }
   0x3   :  { %12 = vsyncpa [#allocation4 + $0x1], 0 }
   0x4   :  { %13 = vsyncpa [#allocation5], 0 }
   0x5   :  { %15 = vsyncpa [#allocation5 + $0x1], 0  ;;  %s1681_s12 = smov 0   ;;  %s1683_s13 = smov 0  }
   0x6   :  { %s1685_s14 = smov 0   ;;  %s1687_s15 = smov 0  }
   0x7 LB: > { %s1702_s16 = sadd.s32 4294967295, %s1647_s15   ;;  %s1334_s17 = sadd.s32 4294967294, %s1647_s15   ;;  %s1647_s15 = sphi %s1687_s15, %s2398_s15   ;;  %s1643_s14 = sphi %s1685_s14, %s2397_s14   ;;  %s1639_s13 = sphi %s1683_s13, %s2396_s13   ;;  %s1635_s12 = sphi %s1681_s12, %s2395_s12  }
   0x8   : > { %s1706_s18 = sadd.s32 1, %s1647_s15   ;;  %s70_s19 = sadd.s32 1, %s1643_s14 }
   0x9   : > { %s67_s20 = ssub.s32 %s1647_s15, %s1706_s18  ;;  %p77_p0 = scmp.ne.s32.totalorder %s1643_s14, %s1639_s13 }
   0xa   : > { %p68_p1 = scmp.eq.s32.totalorder %s67_s20, 0  ;;  %p78_p2 = scmp.eq.s32.totalorder %s1647_s15, 0 }
   0xb   : > { %p83_p3 = scmp.ne.s32.totalorder %s1639_s13, %s1635_s12  ;;  %p2376_p4 = scmp.eq.s32.totalorder %s1702_s16, 0 }
   0xc   : > { %s1718_s21 = scalar_select %p68_p1, %s1643_s14, %s70_s19  }
   0xd   : > { %p1720_p5 = por %p78_p2, %p77_p0  ;;  %p1726_p6 = por %p2376_p4, %p83_p3 }
   0xe   : > { %p107_p7 = scmp.eq.s32.totalorder %s1702_s16, 1  ;;  %p113_p8 = scmp.eq.s32.totalorder %s1334_s17, 1 }
   0xf   : > { %s2380_s23 = scalar_select %p1726_p6, 1, 0 }
  0x10   : > { %p1335_p9 = scmp.ge.s32.totalorder %s1647_s15, 1  ;;  %p120_p10 = scmp.lt.s32.totalorder %s1647_s15, 3 }
  0x11   : > { %p1733_p11 = por %p107_p7, %p77_p0  ;;  %p1737_p12 = por %p113_p8, %p83_p3 }
  0x12   : > { %p1741_p13 = pnand %p1335_p9, %p120_p10  ;;  %p1469_p4 = scmp.lt.s32.totalorder %s1647_s15, 2 }
  0x13   : > { %s2381_s24 = scalar_select %p1733_p11, 1, 0 }
  0x14   : > { %s2382_s25 = scalar_select %p1737_p12, 1, 0 }
  0x15   : > { %p1452_p2 = pneg %p1741_p13  ;;  %s142_s29 = sshll.u32 %s2373_s1, 4  ;;  %s143_s29 = int_to_ptr.vmem [resolvable:$true] %s142_s29 }
  0x16   : > { %p2384_p0 = scmp.eq.s32.totalorder %s1702_s16, 0  ;;  %p1760_p3 = pnand %p1469_p4, %p1720_p5 }
  0x17   : > { %s153_s5 = sand.u32 1, %s1643_s14   ;;  %s1515_s8 = scalar_lea.hbm %s2372_s0, 16 }
  0x18   : > { %p1754_p7 = pnand %p1452_p2, %p2384_p0  ;;  %p1516_p8 = scmp.ne.s32.totalorder %s2372_s0, %s1515_s8 }
  0x19   : > { %p1522_p4 = scmp.lt.u32.totalorder %s1515_s8, %s2372_s0 }
  0x1a   : > { %p1517_p9 = pneg %p1754_p7 }
  0x1c   : > { %p1518_p10 = pnand %p1517_p9, %p1516_p8 }
  0x1e   : > { %p1519_p2 = pneg %p1518_p10 }
  0x20   : > { %p1524_p5 = pnand %p1522_p4, %p1519_p2 }
  0x22   : > { %1527 = shalt.err (!%p1524_p5)
}
  0x23   : > { %s1649_s19 = smov [#allocation3]   ;;  %s1528_s27 = scalar_lea.vmem %s143_s29, 16 }
  0x24   : > { %1455 = dma.hbm_to_smem (!%p1754_p7), %s2372_s0, 16, %s1649_s19, [#allocation6]  }
  0x25   : > { %p1529_p0 = scmp.ne.s32.totalorder %s143_s29, %s1528_s27  ;;  %p1536_p11 = scmp.lt.s32.totalorder %s143_s29, %s143_s29 }
  0x26   : > { %p1537_p8 = scmp.lt.s32.totalorder %s1528_s27, %s1528_s27 }
  0x27   : > { %p1531_p1 = pnand %p1529_p0, %p1517_p9 }
  0x28   : > { %p1538_p10 = por %p1537_p8, %p1536_p11 }
  0x29   : > { %p1532_p12 = pneg %p1531_p1 }
  0x2b   : > { %p1539_p6 = pnand %p1538_p10, %p1532_p12 }
  0x2d   : > { %1542 = shalt.err (!%p1539_p6)
}
  0x2e   : > { %s1650_s28 = smov [#allocation8]   ;;  %s1436_s6 = smul.u32 48, %s153_s5 }
  0x2f   : > { %1458 = dma.vmem_to_smem (!%p1754_p7), %s143_s29, 16, %s1650_s28, [#allocation7]  }
  0x30   : > { %s1437_s7 = smul.u32 768, %s1647_s15  ;;  %s157_s11 = scalar_lea.vmem [#allocation9], %s1436_s6 }
  0x31   : > { %s164_s17 = sshll.u32 %s157_s11, 4  ;;  %s1791_s30 = scalar_lea.sflag [#allocation4], %s153_s5  ;;  %s1789_s17 = int_to_ptr.vmem [resolvable:$true] %s164_s17 }
  0x32   : > { %s1787_s10 = scalar_lea.hbm %s2374_s2, %s1437_s7  ;;  %p1545_p11 = pneg %p1760_p3 }
  0x33   : > { %s1543_s19 = scalar_lea.hbm %s1787_s10, 768  ;;  %s1548_s22 = scalar_lea.hbm %s2374_s2, 1536 }
  0x34   : > { %p1544_p6 = scmp.ne.s32.totalorder %s1787_s10, %s1543_s19  ;;  %p1549_p7 = scmp.lt.u32.totalorder %s1787_s10, %s2374_s2 }
  0x35   : > { %p1550_p9 = scmp.lt.u32.totalorder %s1548_s22, %s1543_s19  ;;  %p1552_p4 = scmp.lt.u32.totalorder %s1543_s19, %s1787_s10 }
  0x36   : > { %p1546_p12 = pnand %p1545_p11, %p1544_p6 }
  0x37   : > { %p1551_p2 = por %p1550_p9, %p1549_p7 }
  0x38   : > { %p1547_p1 = pneg %p1546_p12 }
  0x39   : > { %p1553_p5 = por %p1552_p4, %p1551_p2 }
  0x3b   : > { %p1554_p0 = pnand %p1553_p5, %p1547_p1 }
  0x3d   : > { %1557 = shalt.err (!%p1554_p0)
}
  0x3e   : > { %s1558_s5 = scalar_lea.vmem %s1789_s17, 768  ;;  %s1651_s6 = smov [#allocation9]  }
  0x3f   : > { %p1559_p8 = scmp.ne.s32.totalorder %s1789_s17, %s1558_s5  ;;  %s1563_s7 = sshll.u32 %s1651_s6, 4  ;;  %s1564_s7 = int_to_ptr.vmem [resolvable:$false] %s1563_s7 }
  0x40   : > { %s1565_s8 = scalar_lea.vmem %s1564_s7, 1536  ;;  %p1566_p12 = scmp.lt.s32.totalorder %s1789_s17, %s1564_s7 }
  0x41   : > { %p1561_p10 = pnand %p1559_p8, %p1545_p11  ;;  %p1567_p7 = scmp.lt.s32.totalorder %s1565_s8, %s1558_s5 }
  0x43   : > { %p1562_p6 = pneg %p1561_p10  ;;  %p1568_p9 = por %p1567_p7, %p1566_p12 }
  0x45   : > { %p1569_p2 = pnand %p1568_p9, %p1562_p6 }
  0x47   : > { %1572 = shalt.err (!%p1569_p2)
}
  0x48   : > { %s1652_s9 = smov 128   ;;  %s1653_s11 = smov 8  }
  0x49   : > { %1462 = dma.hbm_to_vmem [thread:$0]  (!%p1760_p3), %s1787_s10, 768, %s1789_s17, %s1791_s30, %s1652_s9, %s1652_s9, %s1653_s11  }
  0x4a   : > { %176 = sbr.rel (%p1741_p13) target bundleno = 569 (0x239), region = 32  ;;  %p2387_p11 = scmp.eq.s32.totalorder (!%p1741_p13), %s1702_s16, 0 }
  0x51   : > { %1618 = dma.done.wait (%p2387_p11), [#allocation6], 16   ;;  %p2388_p1 = pmov %p2387_p11 }
  0x53   : > { %1620 = vsyncadd (%p2388_p1), [#allocation6], 4294967280  ;;  %p2389_p4 = pmov %p2388_p1 }
  0x54   : > { %p2390_p5 = pmov %p2388_p1 }
  0x55   : > { %1622 = dma.done.wait (%p2389_p4), [#allocation7], 16  }
  0x56   : > { %1624 = vsyncadd (%p2390_p5), [#allocation7], 4294967280  ;;  %s1830_s19 = sand.u32 1, %s1639_s13   ;;  %p2391_p13 = scmp.ne.s32.totalorder %s2380_s23, 0 }
  0x57   : > { %s1438_s26 = smul.u32 48, %s1830_s19  ;;  %s187_s4 = scalar_lea.sflag [#allocation4], %s1830_s19 }
  0x59   : > { %s190_s10 = scalar_lea.vmem [#allocation9], %s1438_s26 }
  0x5a   : > { %1626 = dma.done.wait (%p2391_p13), %s187_s4, 768  }
  0x5b   : > { %1628 = vsyncadd (%p2391_p13), %s187_s4, 4294966528 }
  0x5c   : > { %195 = sfence }
  0x5d   : > { %v225_v0 = vld [vmem:[%s190_s10] sm:$0xff]  ;;  %v1343_v1 = vld [vmem:[%s190_s10 + $0x10] sm:$0xff]  ;;  %vm214_vm0 = vcmask 146432   ;;  %s1654_s17 = smov 1   ;;  %vm217_vm1 = vcmask 142336   ;;  %v226_v2 = vld [vmem:[%s190_s10 + $0x8] sm:$0xff] }
  0x5e   : > { %229 = vrot.lane.b32.xlu0 %v225_v0, %s1654_s17  ;;  %243 = vrot.lane.b32.xlu1 %v1343_v1, %s1654_s17  ;;  %v1344_v3 = vld [vmem:[%s190_s10 + $0x18] sm:$0xff]  ;;  %v1655_v4 = vmov 0.0   ;;  %v1345_v5 = vld [vmem:[%s190_s10 + $0x20] sm:$0xff]  ;;  %vm235_vm2 = vcmask 138248   ;;  %s1349_s23 = sld [smem:[#allocation3 + $0x1]]  ;;  %s1350_s30 = sld [smem:[#allocation3 + $0x2]] }
  0x5f   : > { %215 = vst.msk [vmem:[#allocation2] sm:$0xff] %vm214_vm0, %v1655_v4  ;;  %216 = vst.msk [vmem:[#allocation2 + $0x8] sm:$0xff] %vm214_vm0, %v1655_v4  ;;  %v1346_v6 = vld [vmem:[%s190_s10 + $0x28] sm:$0xff]  ;;  %s1352_s29 = sld [smem:[#allocation3 + $0x4]]  ;;  %s1353_s20 = sld [smem:[#allocation3 + $0x5]]  ;;  %vm1214_vm3 = vcmask 130048  }
  0x60   : > { %219 = vst.msk [vmem:[#allocation2 + $0x18] sm:$0xff] %vm214_vm0, %v1655_v4  ;;  %220 = vst.msk [vmem:[#allocation2 + $0x20] sm:$0xff] %vm214_vm0, %v1655_v4  ;;  %s1656_s22 = smov 127   ;;  %s1355_s27 = sld [smem:[#allocation3 + $0x7]] }
  0x61   : > { %222 = vst.msk [vmem:[#allocation2 + $0x30] sm:$0xff] %vm214_vm0, %v1655_v4  ;;  %223 = vst.msk [vmem:[#allocation2 + $0x38] sm:$0xff] %vm214_vm0, %v1655_v4  ;;  %s1657_s28 = smov 126   ;;  %s1356_s5 = sld [smem:[#allocation3 + $0x8]] }
  0x62   : > { %218 = vst.msk [vmem:[#allocation2 + $0x10] sm:$0xf] %vm217_vm1, %v1655_v4  ;;  %221 = vst.msk [vmem:[#allocation2 + $0x28] sm:$0xf] %vm217_vm1, %v1655_v4  ;;  %231 = vrot.lane.b32.xlu0 %v226_v2, %s1654_s17  ;;  %245 = vrot.lane.b32.xlu1 %v1344_v3, %s1654_s17  ;;  %s1358_s6 = sld [smem:[#allocation3 + $0x1c]]  ;;  %s1359_s7 = sld [smem:[#allocation3 + $0x1d]] }
  0x63   : > { %224 = vst.msk [vmem:[#allocation2 + $0x40] sm:$0xf] %vm217_vm1, %v1655_v4  ;;  %s1361_s8 = sld [smem:[#allocation3 + $0x1f]]  ;;  %s1362_s9 = sld [smem:[#allocation3 + $0x20]] }
  0x64   : > { %v285_v11 = vstv %s1349_s23  ;;  %v299_v16 = vstv %s1350_s30  ;;  %s1364_s11 = sld [smem:[#allocation3 + $0x22]]  ;;  %s1365_s4 = sld [smem:[#allocation3 + $0x23]] }
  0x65   : > { %v319_v21 = vstv %s1352_s29  ;;  %v333_v25 = vstv %s1353_s20  ;;  %s1367_s10 = sld [smem:[#allocation3 + $0x37]]  ;;  %s1370_s23 = sld [smem:[#allocation3 + $0x3a]] }
  0x66   : > { %257 = vrot.lane.b32.xlu0 %v1345_v5, %s1654_s17  ;;  %259 = vrot.lane.b32.xlu1 %v1346_v6, %s1654_s17  ;;  %v353_v29 = vstv %s1355_s27  ;;  %s1368_s17 = sld [smem:[#allocation3 + $0x38]]  ;;  %s1371_s30 = sld [smem:[#allocation3 + $0x3b]] }
  0x67   : > { %v367_v33 = vstv %s1356_s5  ;;  %s1373_s29 = sld [smem:[#allocation3 + $0x3d]]  ;;  %s1374_s20 = sld [smem:[#allocation3 + $0x3e]] }
  0x68   : > { %v387_v36 = vstv %s1358_s6  ;;  %v401_v39 = vstv %s1359_s7  ;;  %s1376_s27 = sld [smem:[#allocation3 + $0xa]]  ;;  %s1377_s5 = sld [smem:[#allocation3 + $0xb]] }
  0x69   : > { %v421_v42 = vstv %s1361_s8  ;;  %v435_v45 = vstv %s1362_s9  ;;  %s1379_s6 = sld [smem:[#allocation3 + $0xd]]  ;;  %s1380_s7 = sld [smem:[#allocation3 + $0xe]] }
  0x6a   : > { %v455_v48 = vstv %s1364_s11  ;;  %v469_v51 = vstv %s1365_s4  ;;  %s1382_s8 = sld [smem:[#allocation3 + $0x10]]  ;;  %s1383_s9 = sld [smem:[#allocation3 + $0x11]] }
  0x6b   : > { %v489_v54 = vstv %s1367_s10  ;;  %v523_v60 = vstv %s1370_s23  ;;  %s1385_s11 = sld [smem:[#allocation3 + $0x25]]  ;;  %s1386_s4 = sld [smem:[#allocation3 + $0x26]] }
  0x6c   : > { %v503_v57 = vstv %s1368_s17  ;;  %v537_v63 = vstv %s1371_s30  ;;  %s1388_s10 = sld [smem:[#allocation3 + $0x28]]  ;;  %s1389_s17 = sld [smem:[#allocation3 + $0x29]] }
  0x6d   : > { %v557_v2 = vstv %s1373_s29  ;;  %v571_v5 = vstv %s1374_s20  ;;  %s1391_s23 = sld [smem:[#allocation3 + $0x2b]]  ;;  %s278_s30 = sld [smem:[#allocation3]] }
  0x6e   : > { %s1974_s29 = sld [smem:[#allocation3 + $0x2c]]  ;;  %s1978_s20 = sld [smem:[#allocation8]] }
  0x6f   : > { %p2392_p0 = scmp.ne.s32.totalorder %s2381_s24, 0 }
  0xd0   : > { %v230_v7 = vpop.permute.xlu0 %229  ;;  %v244_v8 = vpop.permute.xlu1 %243 }
  0xd1   : > { %236 = vst.msk [vmem:[#allocation2 + $0x1] sm:$0xff] %vm235_vm2, %v230_v7  ;;  %250 = vst.msk [vmem:[#allocation2 + $0x19] sm:$0xff] %vm235_vm2, %v244_v8  ;;  %v597_v7 = vstv %s1376_s27  ;;  %s1982_s27 = sld [smem:[#allocation3 + $0x40]] }
  0xd4   : > { %v232_v9 = vpop.permute.xlu0 %231  ;;  %v246_v10 = vpop.permute.xlu1 %245 }
  0xd5   : > { %237 = vst.msk [vmem:[#allocation2 + $0x9] sm:$0xff] %vm235_vm2, %v232_v9  ;;  %251 = vst.msk [vmem:[#allocation2 + $0x21] sm:$0xff] %vm235_vm2, %v246_v10 }
  0xd8   : > { %v1844_v12 = vld [vmem:[#allocation2] sm:$0xff]  ;;  %v258_v13 = vpop.permute.xlu0 %257  ;;  %v260_v14 = vpop.permute.xlu1 %259  ;;  %v1924_v6 = vld [vmem:[#allocation2 + $0x18] sm:$0xff] }
  0xd9   : > { %v286_v15 = vmul.f32 %v285_v11, %v1844_v12  ;;  %264 = vst.msk [vmem:[#allocation2 + $0x31] sm:$0xff] %vm235_vm2, %v258_v13  ;;  %265 = vst.msk [vmem:[#allocation2 + $0x39] sm:$0xff] %vm235_vm2, %v260_v14  ;;  %v300_v19 = vmul.f32 %v299_v16, %v1844_v12  ;;  %v1854_v20 = vld [vmem:[#allocation2 + $0x1] sm:$0xff]  ;;  %v388_v38 = vmul.f32 %v387_v36, %v1844_v12  ;;  %v611_v14 = vstv %s1377_s5  ;;  %s1986_s5 = sld [smem:[#allocation3 + $0x3]] }
  0xda   : > { %v320_v23 = vmul.f32 %v319_v21, %v1854_v20  ;;  %v334_v27 = vmul.f32 %v333_v25, %v1854_v20  ;;  %v402_v41 = vmul.f32 %v401_v39, %v1844_v12  ;;  %v422_v44 = vmul.f32 %v421_v42, %v1854_v20 }
  0xdb   : > { %290 = vrot.lane.b32.xlu0 %v286_v15, %s1656_s22  ;;  %v436_v47 = vmul.f32 %v435_v45, %v1854_v20  ;;  %v490_v56 = vmul.f32 %v489_v54, %v1844_v12  ;;  %v504_v59 = vmul.f32 %v503_v57, %v1844_v12  ;;  %v524_v62 = vmul.f32 %v523_v60, %v1854_v20 }
  0xdc   : > { %v1850_v17 = vld [vmem:[#allocation2 + $0x8] sm:$0xff]  ;;  %v538_v1 = vmul.f32 %v537_v63, %v1854_v20  ;;  %v598_v10 = vmul.f32 %v597_v7, %v1924_v6  ;;  %v1932_v13 = vld [vmem:[#allocation2 + $0x20] sm:$0xff] }
  0xdd   : > { %v287_v18 = vmul.f32 %v285_v11, %v1850_v17  ;;  %v301_v22 = vmul.f32 %v299_v16, %v1850_v17  ;;  %v1860_v24 = vld [vmem:[#allocation2 + $0x9] sm:$0xff]  ;;  %v389_v40 = vmul.f32 %v387_v36, %v1850_v17  ;;  %v403_v43 = vmul.f32 %v401_v39, %v1850_v17 }
  0xde   : > { %v321_v26 = vmul.f32 %v319_v21, %v1860_v24  ;;  %v1866_v28 = vld [vmem:[#allocation2 + $0x2] sm:$0xff]  ;;  %v335_v30 = vmul.f32 %v333_v25, %v1860_v24  ;;  %v1872_v32 = vld [vmem:[#allocation2 + $0xa] sm:$0xff]  ;;  %v423_v46 = vmul.f32 %v421_v42, %v1860_v24  ;;  %v437_v49 = vmul.f32 %v435_v45, %v1860_v24 }
  0xdf   : > { %292 = vrot.lane.b32.xlu1 %v287_v18, %s1656_s22  ;;  %304 = vrot.lane.b32.xlu0 %v300_v19, %s1657_s28  ;;  %v354_v31 = vmul.f32 %v353_v29, %v1866_v28  ;;  %v355_v34 = vmul.f32 %v353_v29, %v1872_v32  ;;  %v368_v35 = vmul.f32 %v367_v33, %v1866_v28  ;;  %v1938_v18 = vld [vmem:[#allocation2 + $0x19] sm:$0xff]  ;;  %v631_v19 = vstv %s1379_s6  ;;  %s1992_s6 = sld [smem:[#allocation3 + $0x41]] }
  0xe0   : > { %v369_v37 = vmul.f32 %v367_v33, %v1872_v32  ;;  %v456_v50 = vmul.f32 %v455_v48, %v1866_v28  ;;  %v457_v52 = vmul.f32 %v455_v48, %v1872_v32  ;;  %v470_v53 = vmul.f32 %v469_v51, %v1866_v28  ;;  %v1950_v29 = vld [vmem:[#allocation2 + $0x1a] sm:$0xff] }
  0xe1   : > { %v471_v55 = vmul.f32 %v469_v51, %v1872_v32  ;;  %v491_v58 = vmul.f32 %v489_v54, %v1850_v17  ;;  %v505_v61 = vmul.f32 %v503_v57, %v1850_v17  ;;  %v525_v0 = vmul.f32 %v523_v60, %v1860_v24 }
  0xe2   : > { %v539_v3 = vmul.f32 %v537_v63, %v1860_v24  ;;  %v558_v4 = vmul.f32 %v557_v2, %v1866_v28  ;;  %v559_v8 = vmul.f32 %v557_v2, %v1872_v32  ;;  %v572_v9 = vmul.f32 %v571_v5, %v1866_v28 }
  0xe3   : > { %306 = vrot.lane.b32.xlu1 %v301_v22, %s1657_s28  ;;  %324 = vrot.lane.b32.xlu0 %v320_v23, %s1656_s22  ;;  %v573_v11 = vmul.f32 %v571_v5, %v1872_v32  ;;  %v599_v15 = vmul.f32 %v597_v7, %v1932_v13  ;;  %v612_v16 = vmul.f32 %v611_v14, %v1924_v6  ;;  %v1944_v23 = vld [vmem:[#allocation2 + $0x21] sm:$0xff]  ;;  %v645_v25 = vstv %s1380_s7  ;;  %s2001_s7 = sld [smem:[#allocation3 + $0x43]] }
  0xe4   : > { %v613_v21 = vmul.f32 %v611_v14, %v1932_v13  ;;  %v632_v22 = vmul.f32 %v631_v19, %v1938_v18  ;;  %v279_v51 = vstv %s278_s30  ;;  %v313_v63 = vstv %s1986_s5  ;;  %s2044_s30 = sld [smem:[#allocation3 + $0x13]]  ;;  %s2075_s5 = sld [smem:[#allocation3 + $0x21]] }
  0xe5   : > { %v280_v54 = vmul.f32 %v279_v51, %v1844_v12 }
  0xe7   : > { %326 = vrot.lane.b32.xlu1 %v321_v26, %s1656_s22  ;;  %338 = vrot.lane.b32.xlu0 %v334_v27, %s1657_s28  ;;  %v633_v26 = vmul.f32 %v631_v19, %v1944_v23  ;;  %v646_v27 = vmul.f32 %v645_v25, %v1938_v18 }
  0xeb   : > { %340 = vrot.lane.b32.xlu1 %v335_v30, %s1657_s28  ;;  %358 = vrot.lane.b32.xlu0 %v354_v31, %s1656_s22  ;;  %v665_v30 = vstv %s1382_s8  ;;  %v647_v31 = vmul.f32 %v645_v25, %v1944_v23  ;;  %s2006_s8 = sld [smem:[#allocation3 + $0x6]]  ;;  %v835_v25 = vstv %s2001_s7 }
  0xec   : > { %v666_v33 = vmul.f32 %v665_v30, %v1950_v29  ;;  %s2091_s7 = sld [smem:[#allocation3 + $0x36]] }
  0xef   : > { %360 = vrot.lane.b32.xlu1 %v355_v34, %s1656_s22  ;;  %372 = vrot.lane.b32.xlu0 %v368_v35, %s1657_s28  ;;  %v1956_v34 = vld [vmem:[#allocation2 + $0x22] sm:$0xff]  ;;  %v679_v35 = vstv %s1383_s9  ;;  %s2012_s9 = sld [smem:[#allocation3 + $0x44]] }
  0xf0   : > { %v667_v36 = vmul.f32 %v665_v30, %v1956_v34  ;;  %v681_v39 = vmul.f32 %v679_v35, %v1956_v34 }
  0xf3   : > { %374 = vrot.lane.b32.xlu1 %v369_v37, %s1657_s28  ;;  %392 = vrot.lane.b32.xlu0 %v388_v38, %s1656_s22  ;;  %v680_v37 = vmul.f32 %v679_v35, %v1950_v29  ;;  %v699_v38 = vstv %s1385_s11  ;;  %s2018_s11 = sld [smem:[#allocation3 + $0x1b]] }
  0xf4   : > { %v701_v42 = vmul.f32 %v699_v38, %v1932_v13 }
  0xf7   : > { %394 = vrot.lane.b32.xlu1 %v389_v40, %s1656_s22  ;;  %406 = vrot.lane.b32.xlu0 %v402_v41, %s1657_s28  ;;  %v700_v40 = vmul.f32 %v699_v38, %v1924_v6  ;;  %v713_v41 = vstv %s1386_s4  ;;  %s2022_s4 = sld [smem:[#allocation3 + $0x46]] }
  0xf8   : > { %v715_v45 = vmul.f32 %v713_v41, %v1932_v13 }
  0xfb   : > { %408 = vrot.lane.b32.xlu1 %v403_v43, %s1657_s28  ;;  %426 = vrot.lane.b32.xlu0 %v422_v44, %s1656_s22  ;;  %v714_v43 = vmul.f32 %v713_v41, %v1924_v6  ;;  %v733_v44 = vstv %s1388_s10  ;;  %s2027_s10 = sld [smem:[#allocation3 + $0x9]] }
  0xfc   : > { %v735_v48 = vmul.f32 %v733_v44, %v1944_v23 }
  0xff   : > { %428 = vrot.lane.b32.xlu1 %v423_v46, %s1656_s22  ;;  %440 = vrot.lane.b32.xlu0 %v436_v47, %s1657_s28  ;;  %v734_v46 = vmul.f32 %v733_v44, %v1938_v18  ;;  %v747_v47 = vstv %s1389_s17  ;;  %s2031_s17 = sld [smem:[#allocation8 + $0x1]]  ;;  %v837_v44 = vmul.f32 %v835_v25, %v1944_v23 }
 0x103   : > { %442 = vrot.lane.b32.xlu1 %v437_v49, %s1657_s28  ;;  %460 = vrot.lane.b32.xlu0 %v456_v50, %s1656_s22  ;;  %v748_v49 = vmul.f32 %v747_v47, %v1938_v18  ;;  %v767_v50 = vstv %s1391_s23  ;;  %s2035_s23 = sld [smem:[#allocation3 + $0x47]] }
 0x107   : > { %462 = vrot.lane.b32.xlu1 %v457_v52, %s1656_s22  ;;  %474 = vrot.lane.b32.xlu0 %v470_v53, %s1657_s28  ;;  %v749_v52 = vmul.f32 %v747_v47, %v1944_v23  ;;  %v768_v53 = vmul.f32 %v767_v50, %v1950_v29 }
 0x10b   : > { %476 = vrot.lane.b32.xlu1 %v471_v55, %s1657_s28  ;;  %494 = vrot.lane.b32.xlu0 %v490_v56, %s1656_s22  ;;  %v781_v55 = vstv %s1974_s29  ;;  %v267_v56 = vstv %s1978_s20  ;;  %s2048_s29 = sld [smem:[#allocation3 + $0x1e]] }
 0x10c   : > { %v282_v60 = vadd.f32 %v280_v54, %v267_v56  ;;  %s2056_s20 = sld [smem:[#allocation3 + $0x2e]] }
 0x10f   : > { %496 = vrot.lane.b32.xlu1 %v491_v58, %s1656_s22  ;;  %508 = vrot.lane.b32.xlu0 %v504_v59, %s1657_s28  ;;  %v769_v58 = vmul.f32 %v767_v50, %v1956_v34  ;;  %v782_v59 = vmul.f32 %v781_v55, %v1950_v29  ;;  %v591_v50 = vstv %s2027_s10  ;;  %s2117_s10 = sld [smem:[#allocation3 + $0x16]] }
 0x113   : > { %510 = vrot.lane.b32.xlu1 %v505_v61, %s1657_s28  ;;  %528 = vrot.lane.b32.xlu0 %v524_v62, %s1656_s22  ;;  %v281_v61 = vmul.f32 %v279_v51, %v1850_v17  ;;  %v801_v62 = vstv %s1982_s27  ;;  %s2069_s27 = sld [smem:[#allocation3 + $0x49]] }
 0x115   : > { %v283_v5 = vadd.f32 %v281_v61, %v267_v56  ;;  %v592_v61 = vmul.f32 %v591_v50, %v1924_v6 }
 0x117   : > { %530 = vrot.lane.b32.xlu1 %v525_v0, %s1656_s22  ;;  %542 = vrot.lane.b32.xlu0 %v538_v1, %s1657_s28 }
 0x11b   : > { %544 = vrot.lane.b32.xlu1 %v539_v3, %s1657_s28  ;;  %562 = vrot.lane.b32.xlu0 %v558_v4, %s1656_s22  ;;  %v783_v3 = vmul.f32 %v781_v55, %v1956_v34  ;;  %v802_v4 = vmul.f32 %v801_v62, %v1924_v6 }
 0x11f   : > { %564 = vrot.lane.b32.xlu1 %v559_v8, %s1656_s22  ;;  %576 = vrot.lane.b32.xlu0 %v572_v9, %s1657_s28  ;;  %v314_v8 = vmul.f32 %v313_v63, %v1854_v20  ;;  %v815_v9 = vstv %s1992_s6  ;;  %s2085_s6 = sld [smem:[#allocation3 + $0x14]] }
 0x120   : > { %v816_v19 = vmul.f32 %v815_v9, %v1924_v6  ;;  %v817_v35 = vmul.f32 %v815_v9, %v1932_v13  ;;  %v2066_v9 = vld [vmem:[#allocation2 + $0x30] sm:$0xff] }
 0x123   : > { %578 = vrot.lane.b32.xlu1 %v573_v11, %s1657_s28  ;;  %602 = vrot.lane.b32.xlu0 %v598_v10, %s1656_s22 }
 0x127   : > { %604 = vrot.lane.b32.xlu1 %v599_v15, %s1656_s22  ;;  %616 = vrot.lane.b32.xlu0 %v612_v16, %s1657_s28  ;;  %v803_v16 = vmul.f32 %v801_v62, %v1932_v13 }
 0x12b   : > { %618 = vrot.lane.b32.xlu1 %v613_v21, %s1657_s28  ;;  %636 = vrot.lane.b32.xlu0 %v632_v22, %s1656_s22  ;;  %v315_v22 = vmul.f32 %v313_v63, %v1860_v24 }
 0x12f   : > { %638 = vrot.lane.b32.xlu1 %v633_v26, %s1656_s22  ;;  %650 = vrot.lane.b32.xlu0 %v646_v27, %s1657_s28  ;;  %v347_v26 = vstv %s2006_s8  ;;  %s2095_s8 = sld [smem:[#allocation3 + $0x2f]] }
 0x130   : > { %v348_v38 = vmul.f32 %v347_v26, %v1866_v28 }
 0x133   : > { %652 = vrot.lane.b32.xlu1 %v647_v31, %s1657_s28  ;;  %670 = vrot.lane.b32.xlu0 %v666_v33, %s1656_s22 }
 0x137   : > { %672 = vrot.lane.b32.xlu1 %v667_v36, %s1656_s22  ;;  %684 = vrot.lane.b32.xlu0 %v680_v37, %s1657_s28  ;;  %v836_v36 = vmul.f32 %v835_v25, %v1938_v18 }
 0x13b   : > { %686 = vrot.lane.b32.xlu1 %v681_v39, %s1657_s28  ;;  %704 = vrot.lane.b32.xlu0 %v700_v40, %s1656_s22  ;;  %v849_v39 = vstv %s2012_s9  ;;  %s2100_s9 = sld [smem:[#allocation3 + $0x24]] }
 0x13c   : > { %v851_v56 = vmul.f32 %v849_v39, %v1944_v23 }
 0x13f   : > { %706 = vrot.lane.b32.xlu1 %v701_v42, %s1656_s22  ;;  %718 = vrot.lane.b32.xlu0 %v714_v43, %s1657_s28 }
 0x143   : > { %720 = vrot.lane.b32.xlu1 %v715_v45, %s1657_s28  ;;  %738 = vrot.lane.b32.xlu0 %v734_v46, %s1656_s22  ;;  %v850_v45 = vmul.f32 %v849_v39, %v1938_v18  ;;  %v381_v46 = vstv %s2018_s11  ;;  %s2104_s11 = sld [smem:[#allocation8 + $0x2]] }
 0x147   : > { %740 = vrot.lane.b32.xlu1 %v735_v48, %s1656_s22  ;;  %752 = vrot.lane.b32.xlu0 %v748_v49, %s1657_s28  ;;  %v349_v48 = vmul.f32 %v347_v26, %v1872_v32  ;;  %v869_v49 = vstv %s2022_s4  ;;  %s2108_s4 = sld [smem:[#allocation3 + $0x4a]] }
 0x14b   : > { %754 = vrot.lane.b32.xlu1 %v749_v52, %s1657_s28  ;;  %772 = vrot.lane.b32.xlu0 %v768_v53, %s1656_s22  ;;  %v382_v53 = vmul.f32 %v381_v46, %v1844_v12 }
 0x14d   : > { %v291_v57 = vpop.permute.xlu0 %290 }
 0x14e   : > { %v296_v0 = vadd.f32 %v291_v57, %v282_v60  ;;  %v870_v57 = vmul.f32 %v869_v49, %v1950_v29  ;;  %v883_v60 = vstv %s2035_s23  ;;  %s2129_s23 = sld [smem:[#allocation3 + $0x31]] }
 0x14f   : > { %774 = vrot.lane.b32.xlu1 %v769_v58, %s1656_s22  ;;  %786 = vrot.lane.b32.xlu0 %v782_v59, %s1657_s28  ;;  %v269_v58 = vstv %s2031_s17  ;;  %s2121_s17 = sld [smem:[#allocation3 + $0x39]] }
 0x150   : > { %v384_v63 = vadd.f32 %v382_v53, %v269_v58  ;;  %v923_v53 = vstv %s2085_s6  ;;  %s2177_s6 = sld [smem:[#allocation3 + $0x4d]] }
 0x151   : > { %v293_v1 = vpop.permute.xlu1 %292  ;;  %v305_v2 = vpop.permute.xlu0 %304 }
 0x152   : > { %v310_v7 = vadd.f32 %v305_v2, %v296_v0  ;;  %v297_v10 = vadd.f32 %v293_v1, %v283_v5  ;;  %v383_v0 = vmul.f32 %v381_v46, %v1850_v17  ;;  %v884_v5 = vmul.f32 %v883_v60, %v1950_v29 }
 0x153   : > { %788 = vrot.lane.b32.xlu1 %v783_v3, %s1657_s28  ;;  %806 = vrot.lane.b32.xlu0 %v802_v4, %s1656_s22  ;;  %v871_v4 = vmul.f32 %v869_v49, %v1956_v34 }
 0x154   : > { %v316_v11 = vadd.f32 %v314_v8, %v310_v7 }
 0x155   : > { %v307_v14 = vpop.permute.xlu1 %306  ;;  %v325_v15 = vpop.permute.xlu0 %324 }
 0x156   : > { %v311_v21 = vadd.f32 %v307_v14, %v297_v10  ;;  %v330_v27 = vadd.f32 %v325_v15, %v316_v11  ;;  %v909_v10 = vstv %s2044_s30  ;;  %v593_v11 = vmul.f32 %v591_v50, %v1932_v13  ;;  %s2142_s30 = sld [smem:[#allocation3 + $0x4c]] }
 0x157   : > { %808 = vrot.lane.b32.xlu1 %v803_v16, %s1656_s22  ;;  %820 = vrot.lane.b32.xlu0 %v816_v19, %s1657_s28  ;;  %v415_v14 = vstv %s2048_s29  ;;  %v385_v15 = vadd.f32 %v383_v0, %v269_v58  ;;  %v910_v25 = vmul.f32 %v909_v10, %v2066_v9  ;;  %v924_v58 = vmul.f32 %v923_v53, %v2066_v9  ;;  %s2148_s29 = sld [smem:[#allocation3 + $0x3c]] }
 0x158   : > { %v317_v30 = vadd.f32 %v315_v22, %v311_v21  ;;  %v885_v22 = vmul.f32 %v883_v60, %v1956_v34  ;;  %v693_v0 = vstv %s2100_s9  ;;  %s2195_s9 = sld [smem:[#allocation3 + $0x34]] }
 0x159   : > { %v327_v31 = vpop.permute.xlu1 %326  ;;  %v339_v33 = vpop.permute.xlu0 %338 }
 0x15a   : > { %v344_v37 = vadd.f32 %v339_v33, %v330_v27  ;;  %v331_v40 = vadd.f32 %v327_v31, %v317_v30  ;;  %v416_v30 = vmul.f32 %v415_v14, %v1854_v20  ;;  %v2082_v31 = vld [vmem:[#allocation2 + $0x38] sm:$0xff]  ;;  %v1011_v33 = vstv %s2056_s20  ;;  %s2158_s20 = sld [smem:[#allocation3 + $0x17]] }
 0x15b   : > { %822 = vrot.lane.b32.xlu1 %v817_v35, %s1657_s28  ;;  %840 = vrot.lane.b32.xlu0 %v836_v36, %s1656_s22  ;;  %v1012_v39 = vmul.f32 %v1011_v33, %v2066_v9 }
 0x15c   : > { %v350_v41 = vadd.f32 %v348_v38, %v344_v37  ;;  %v911_v38 = vmul.f32 %v909_v10, %v2082_v31  ;;  %v271_v10 = vstv %s2104_s11  ;;  %s2208_s11 = sld [smem:[#allocation3 + $0x4f]] }
 0x15d   : > { %v341_v42 = vpop.permute.xlu1 %340  ;;  %v359_v43 = vpop.permute.xlu0 %358 }
 0x15e   : > { %v345_v47 = vadd.f32 %v341_v42, %v331_v40  ;;  %v364_v51 = vadd.f32 %v359_v43, %v350_v41  ;;  %v417_v42 = vmul.f32 %v415_v14, %v1860_v24  ;;  %v1113_v43 = vstv %s2069_s27  ;;  %s2166_s27 = sld [smem:[#allocation3 + $0x32]] }
 0x15f   : > { %842 = vrot.lane.b32.xlu1 %v837_v44, %s1656_s22  ;;  %854 = vrot.lane.b32.xlu0 %v850_v45, %s1657_s28  ;;  %v449_v44 = vstv %s2075_s5  ;;  %v1114_v49 = vmul.f32 %v1113_v43, %v2066_v9  ;;  %s2171_s5 = sld [smem:[#allocation3 + $0x3f]] }
 0x160   : > { %v351_v52 = vadd.f32 %v349_v48, %v345_v47  ;;  %v1013_v48 = vmul.f32 %v1011_v33, %v2082_v31 }
 0x161   : > { %v361_v54 = vpop.permute.xlu1 %360  ;;  %v373_v55 = vpop.permute.xlu0 %372 }
 0x162   : > { %v378_v59 = vadd.f32 %v373_v55, %v364_v51  ;;  %v365_v62 = vadd.f32 %v361_v54, %v351_v52  ;;  %v450_v52 = vmul.f32 %v449_v44, %v1866_v28 }
 0x163   : > { %856 = vrot.lane.b32.xlu1 %v851_v56, %s1657_s28  ;;  %874 = vrot.lane.b32.xlu0 %v870_v57, %s1656_s22  ;;  %v1115_v57 = vmul.f32 %v1113_v43, %v2082_v31 }
 0x164   : > { %v2062_v1 = vadd.f32 %v592_v61, %v378_v59  ;;  %v483_v59 = vstv %s2091_s7  ;;  %s2185_s7 = sld [smem:[#allocation3 + $0x19]] }
 0x165   : > { %v375_v2 = vpop.permute.xlu1 %374  ;;  %v393_v3 = vpop.permute.xlu0 %392 }
 0x166   : > { %v379_v7 = vadd.f32 %v375_v2, %v365_v62  ;;  %v398_v8 = vadd.f32 %v393_v3, %v384_v63  ;;  %v451_v62 = vmul.f32 %v449_v44, %v1872_v32  ;;  %v1025_v63 = vstv %s2095_s8  ;;  %s2189_s8 = sld [smem:[#allocation3 + $0xc]] }
 0x167   : > { %876 = vrot.lane.b32.xlu1 %v871_v4, %s1656_s22  ;;  %888 = vrot.lane.b32.xlu0 %v884_v5, %s1657_s28  ;;  %v484_v3 = vmul.f32 %v483_v59, %v1844_v12 }
 0x168   : > { %v2077_v16 = vadd.f32 %v593_v11, %v379_v7  ;;  %v925_v7 = vmul.f32 %v923_v53, %v2082_v31 }
 0x169   : > { %v395_v19 = vpop.permute.xlu1 %394  ;;  %v407_v21 = vpop.permute.xlu0 %406  ;;  %v486_v12 = vadd.f32 %v484_v3, %v271_v10  ;;  %v957_v3 = vstv %s2158_s20  ;;  %s1411_s20 = sld [smem:[#allocation3 + $0x2d]] }
 0x16a   : > { %v399_v26 = vadd.f32 %v395_v19, %v385_v15  ;;  %v412_v27 = vadd.f32 %v407_v21, %v398_v8  ;;  %v1026_v8 = vmul.f32 %v1025_v63, %v2066_v9  ;;  %v1127_v15 = vstv %s2108_s4  ;;  %s2214_s4 = sld [smem:[#allocation3 + $0xf]] }
 0x16b   : > { %890 = vrot.lane.b32.xlu1 %v885_v22, %s1657_s28  ;;  %914 = vrot.lane.b32.xlu0 %v910_v25, %s1656_s22  ;;  %v694_v19 = vmul.f32 %v693_v0, %v1924_v6  ;;  %v485_v21 = vmul.f32 %v483_v59, %v1850_v17  ;;  %v517_v17 = vstv %s2121_s17  ;;  %v1129_v43 = vmul.f32 %v1127_v15, %v2082_v31  ;;  %s2233_s17 = sld [smem:[#allocation3 + $0x35]] }
 0x16c   : > { %v418_v35 = vadd.f32 %v416_v30, %v412_v27  ;;  %v1027_v27 = vmul.f32 %v1025_v63, %v2082_v31  ;;  %v1128_v30 = vmul.f32 %v1127_v15, %v2066_v9  ;;  %v1059_v15 = vstv %s2166_s27  ;;  %s1399_s27 = sld [smem:[#allocation3 + $0x45]] }
 0x16d   : > { %v409_v36 = vpop.permute.xlu1 %408  ;;  %v427_v37 = vpop.permute.xlu0 %426 }
 0x16e   : > { %v413_v40 = vadd.f32 %v409_v36, %v399_v26  ;;  %v432_v41 = vadd.f32 %v427_v37, %v418_v35  ;;  %v2139_v36 = vld [vmem:[#allocation2 + $0x31] sm:$0xff]  ;;  %v943_v37 = vstv %s2117_s10  ;;  %s2225_s10 = sld [smem:[#allocation3 + $0x1a]] }
 0x16f   : > { %916 = vrot.lane.b32.xlu1 %v911_v38, %s1656_s22  ;;  %1016 = vrot.lane.b32.xlu0 %v1012_v39, %s1656_s22  ;;  %v695_v38 = vmul.f32 %v693_v0, %v1932_v13  ;;  %v487_v39 = vadd.f32 %v485_v21, %v271_v10  ;;  %v944_v44 = vmul.f32 %v943_v37, %v2139_v36 }
 0x170   : > { %v419_v45 = vadd.f32 %v417_v42, %v413_v40  ;;  %v958_v10 = vmul.f32 %v957_v3, %v2139_v36 }
 0x171   : > { %v429_v46 = vpop.permute.xlu1 %428  ;;  %v441_v47 = vpop.permute.xlu0 %440 }
 0x172   : > { %v433_v50 = vadd.f32 %v429_v46, %v419_v45  ;;  %v446_v51 = vadd.f32 %v441_v47, %v432_v41  ;;  %v518_v47 = vmul.f32 %v517_v17, %v1854_v20  ;;  %v519_v20 = vmul.f32 %v517_v17, %v1860_v24 }
 0x173   : > { %1018 = vrot.lane.b32.xlu1 %v1013_v48, %s1656_s22  ;;  %1118 = vrot.lane.b32.xlu0 %v1114_v49, %s1656_s22  ;;  %v2155_v48 = vld [vmem:[#allocation2 + $0x39] sm:$0xff]  ;;  %v1045_v49 = vstv %s2129_s23  ;;  %s2238_s23 = sld [smem:[#allocation3 + $0x12]] }
 0x174   : > { %v452_v54 = vadd.f32 %v450_v52, %v446_v51  ;;  %v945_v53 = vmul.f32 %v943_v37, %v2155_v48 }
 0x175   : > { %v443_v55 = vpop.permute.xlu1 %442  ;;  %v461_v56 = vpop.permute.xlu0 %460 }
 0x176   : > { %v447_v60 = vadd.f32 %v443_v55, %v433_v50  ;;  %v466_v61 = vadd.f32 %v461_v56, %v452_v54  ;;  %v1046_v54 = vmul.f32 %v1045_v49, %v2139_v36 }
 0x177   : > { %1120 = vrot.lane.b32.xlu1 %v1115_v57, %s1656_s22  ;;  %928 = vrot.lane.b32.xlu0 %v924_v58, %s1657_s28  ;;  %v1147_v57 = vstv %s2142_s30  ;;  %v551_v58 = vstv %s2148_s29  ;;  %s2244_s30 = sld [smem:[#allocation3 + $0x50]]  ;;  %s2254_s29 = sld [smem:[#allocation3 + $0x27]] }
 0x178   : > { %v453_v2 = vadd.f32 %v451_v62, %v447_v60  ;;  %v1047_v62 = vmul.f32 %v1045_v49, %v2155_v48  ;;  %v1148_v63 = vmul.f32 %v1147_v57, %v2139_v36 }
 0x179   : > { %v463_v4 = vpop.permute.xlu1 %462  ;;  %v475_v5 = vpop.permute.xlu0 %474 }
 0x17a   : > { %v467_v11 = vadd.f32 %v463_v4, %v453_v2  ;;  %v480_v14 = vadd.f32 %v475_v5, %v466_v61  ;;  %v552_v2 = vmul.f32 %v551_v58, %v1866_v28  ;;  %v553_v28 = vmul.f32 %v551_v58, %v1872_v32 }
 0x17b   : > { %930 = vrot.lane.b32.xlu1 %v925_v7, %s1657_s28  ;;  %1030 = vrot.lane.b32.xlu0 %v1026_v8, %s1657_s28  ;;  %v1149_v8 = vmul.f32 %v1147_v57, %v2155_v48 }
 0x17c   : > { %v2135_v22 = vadd.f32 %v694_v19, %v480_v14  ;;  %v795_v19 = vstv %s2171_s5  ;;  %s1420_s5 = sld [smem:[#allocation3 + $0x48]] }
 0x17d   : > { %v477_v25 = vpop.permute.xlu1 %476  ;;  %v495_v26 = vpop.permute.xlu0 %494 }
 0x17e   : > { %v481_v33 = vadd.f32 %v477_v25, %v467_v11  ;;  %v500_v35 = vadd.f32 %v495_v26, %v486_v12  ;;  %v959_v26 = vmul.f32 %v957_v3, %v2155_v48 }
 0x17f   : > { %1032 = vrot.lane.b32.xlu1 %v1027_v27, %s1657_s28  ;;  %1132 = vrot.lane.b32.xlu0 %v1128_v30, %s1657_s28  ;;  %v1060_v27 = vmul.f32 %v1059_v15, %v2139_v36 }
 0x180   : > { %v2150_v40 = vadd.f32 %v695_v38, %v481_v33  ;;  %v1161_v33 = vstv %s2177_s6  ;;  %s1405_s6 = sld [smem:[#allocation3 + $0x15]] }
 0x181   : > { %v497_v41 = vpop.permute.xlu1 %496  ;;  %v509_v42 = vpop.permute.xlu0 %508 }
 0x182   : > { %v501_v45 = vadd.f32 %v497_v41, %v487_v39  ;;  %v514_v46 = vadd.f32 %v509_v42, %v500_v35  ;;  %v796_v35 = vmul.f32 %v795_v19, %v1924_v6  ;;  %v1061_v39 = vmul.f32 %v1059_v15, %v2155_v48 }
 0x183   : > { %1134 = vrot.lane.b32.xlu1 %v1129_v43, %s1657_s28  ;;  %948 = vrot.lane.b32.xlu0 %v944_v44, %s1656_s22  ;;  %v1162_v41 = vmul.f32 %v1161_v33, %v2139_v36  ;;  %v2205_v44 = vld [vmem:[#allocation2 + $0x32] sm:$0xff]  ;;  %v797_v6 = vmul.f32 %v795_v19, %v1932_v13 }
 0x184   : > { %v520_v50 = vadd.f32 %v518_v47, %v514_v46  ;;  %v625_v46 = vstv %s2189_s8  ;;  %s2293_s8 = sld [smem:[#allocation3 + $0x4b]] }
 0x185   : > { %v511_v51 = vpop.permute.xlu1 %510  ;;  %v529_v52 = vpop.permute.xlu0 %528  ;;  %v626_v13 = vmul.f32 %v625_v46, %v1938_v18 }
 0x186   : > { %v515_v55 = vadd.f32 %v511_v51, %v501_v45  ;;  %v534_v56 = vadd.f32 %v529_v52, %v520_v50  ;;  %v977_v45 = vstv %s2185_s7  ;;  %s1414_s7 = sld [smem:[#allocation3 + $0x30]] }
 0x187   : > { %950 = vrot.lane.b32.xlu1 %v945_v53, %s1656_s22  ;;  %1050 = vrot.lane.b32.xlu0 %v1046_v54, %s1656_s22  ;;  %v978_v51 = vmul.f32 %v977_v45, %v2205_v44  ;;  %v2222_v54 = vld [vmem:[#allocation2 + $0x3a] sm:$0xff] }
 0x188   : > { %v521_v59 = vadd.f32 %v519_v20, %v515_v55  ;;  %v1079_v55 = vstv %s2195_s9  ;;  %v979_v58 = vmul.f32 %v977_v45, %v2222_v54  ;;  %s1408_s9 = sld [smem:[#allocation3 + $0x18]] }
 0x189   : > { %v531_v60 = vpop.permute.xlu1 %530  ;;  %v543_v61 = vpop.permute.xlu0 %542  ;;  %v1081_v3 = vmul.f32 %v1079_v55, %v2222_v54 }
 0x18a   : > { %v535_v0 = vadd.f32 %v531_v60, %v521_v59  ;;  %v548_v24 = vadd.f32 %v543_v61, %v534_v56  ;;  %v627_v61 = vmul.f32 %v625_v46, %v1944_v23 }
 0x18b   : > { %1052 = vrot.lane.b32.xlu1 %v1047_v62, %s1656_s22  ;;  %1152 = vrot.lane.b32.xlu0 %v1148_v63, %s1656_s22  ;;  %v1181_v62 = vstv %s2208_s11  ;;  %v659_v63 = vstv %s2214_s4  ;;  %s1417_s11 = sld [smem:[#allocation3 + $0x33]]  ;;  %s2305_s4 = sld [smem:[#allocation3 + $0x4e]] }
 0x18c   : > { %v554_v4 = vadd.f32 %v552_v2, %v548_v24  ;;  %v1183_v15 = vmul.f32 %v1181_v62, %v2222_v54 }
 0x18d   : > { %v545_v5 = vpop.permute.xlu1 %544  ;;  %v563_v7 = vpop.permute.xlu0 %562 }
 0x18e   : > { %v549_v11 = vadd.f32 %v545_v5, %v535_v0  ;;  %v568_v14 = vadd.f32 %v563_v7, %v554_v4  ;;  %v1182_v4 = vmul.f32 %v1181_v62, %v2205_v44 }
 0x18f   : > { %1154 = vrot.lane.b32.xlu1 %v1149_v8, %s1656_s22  ;;  %962 = vrot.lane.b32.xlu0 %v958_v10, %s1657_s28  ;;  %v660_v8 = vmul.f32 %v659_v63, %v1950_v29  ;;  %v991_v10 = vstv %s2225_s10  ;;  %s213_s10 = scalar_lea.vmem [#allocation10], %s1438_s26 }
 0x190   : > { %v555_v12 = vadd.f32 %v553_v28, %v549_v11  ;;  %v992_v19 = vmul.f32 %v991_v10, %v2205_v44  ;;  %s1237_s26 = sshll.u32 %s213_s10, 4  ;;  %s2327_s26 = int_to_ptr.vmem [resolvable:$true] %s1237_s26 }
 0x191   : > { %v565_v21 = vpop.permute.xlu1 %564  ;;  %v577_v25 = vpop.permute.xlu0 %576 }
 0x192   : > { %v569_v30 = vadd.f32 %v565_v21, %v555_v12  ;;  %v582_v32 = vadd.f32 %v577_v25, %v568_v14  ;;  %v661_v25 = vmul.f32 %v659_v63, %v1956_v34 }
 0x193   : > { %964 = vrot.lane.b32.xlu1 %v959_v26, %s1657_s28  ;;  %1064 = vrot.lane.b32.xlu0 %v1060_v27, %s1657_s28  ;;  %v1093_v26 = vstv %s2233_s17  ;;  %v903_v27 = vstv %s2238_s23  ;;  %s1439_s17 = smul.u32 768, %s1702_s16  ;;  %s1224_s16 = scalar_lea.sflag [#allocation5], %s1830_s19 }
 0x194   : > { %v2200_v37 = vadd.f32 %v796_v35, %v582_v32  ;;  %v993_v35 = vmul.f32 %v991_v10, %v2222_v54  ;;  %v1095_v46 = vmul.f32 %v1093_v26, %v2222_v54 }
 0x195   : > { %v579_v38 = vpop.permute.xlu1 %578  ;;  %v603_v17 = vpop.permute.xlu0 %602 }
 0x196   : > { %v583_v42 = vadd.f32 %v579_v38, %v569_v30  ;;  %v608_v43 = vadd.f32 %v603_v17, %v2062_v1  ;;  %v1163_v1 = vmul.f32 %v1161_v33, %v2155_v48  ;;  %v1094_v38 = vmul.f32 %v1093_v26, %v2205_v44 }
 0x197   : > { %1066 = vrot.lane.b32.xlu1 %v1061_v39, %s1657_s28  ;;  %1166 = vrot.lane.b32.xlu0 %v1162_v41, %s1657_s28  ;;  %v1195_v41 = vstv %s2244_s30 }
 0x198   : > { %v2216_v47 = vadd.f32 %v797_v6, %v583_v42  ;;  %v904_v42 = vmul.f32 %v903_v27, %v2066_v9 }
 0x199   : > { %v605_v49 = vpop.permute.xlu1 %604  ;;  %v617_v50 = vpop.permute.xlu0 %616 }
 0x19a   : > { %v609_v52 = vadd.f32 %v605_v49, %v2077_v16  ;;  %v622_v53 = vadd.f32 %v617_v50, %v608_v43  ;;  %v1080_v16 = vmul.f32 %v1079_v55, %v2205_v44  ;;  %v1196_v49 = vmul.f32 %v1195_v41, %v2205_v44 }
 0x19b   : > { %1168 = vrot.lane.b32.xlu1 %v1163_v1, %s1657_s28  ;;  %982 = vrot.lane.b32.xlu0 %v978_v51, %s1656_s22  ;;  %v905_v51 = vmul.f32 %v903_v27, %v2082_v31 }
 0x19c   : > { %v628_v56 = vadd.f32 %v626_v13, %v622_v53 }
 0x19d   : > { %v619_v20 = vpop.permute.xlu1 %618  ;;  %v637_v57 = vpop.permute.xlu0 %636 }
 0x19e   : > { %v623_v59 = vadd.f32 %v619_v20, %v609_v52  ;;  %v642_v60 = vadd.f32 %v637_v57, %v628_v56  ;;  %v727_v52 = vstv %s2254_s29  ;;  %v1197_v56 = vmul.f32 %v1195_v41, %v2222_v54  ;;  %s2325_s29 = scalar_lea.hbm %s2375_s3, %s1439_s17 }
 0x19f   : > { %984 = vrot.lane.b32.xlu1 %v979_v58, %s1656_s22  ;;  %1084 = vrot.lane.b32.xlu0 %v1080_v16, %s1656_s22  ;;  %v728_v58 = vmul.f32 %v727_v52, %v1938_v18  ;;  %v729_v62 = vmul.f32 %v727_v52, %v1944_v23 }
 0x1a0   : > { %v629_v0 = vadd.f32 %v627_v61, %v623_v59 }
 0x1a1   : > { %v639_v24 = vpop.permute.xlu1 %638  ;;  %v651_v2 = vpop.permute.xlu0 %650 }
 0x1a2   : > { %v643_v5 = vadd.f32 %v639_v24, %v629_v0  ;;  %v656_v7 = vadd.f32 %v651_v2, %v642_v60 }
 0x1a3   : > { %1086 = vrot.lane.b32.xlu1 %v1081_v3, %s1656_s22  ;;  %1186 = vrot.lane.b32.xlu0 %v1182_v4, %s1656_s22 }
 0x1a4   : > { %v662_v11 = vadd.f32 %v660_v8, %v656_v7 }
 0x1a5   : > { %v653_v14 = vpop.permute.xlu1 %652  ;;  %v671_v28 = vpop.permute.xlu0 %670 }
 0x1a6   : > { %v657_v12 = vadd.f32 %v653_v14, %v643_v5  ;;  %v676_v21 = vadd.f32 %v671_v28, %v662_v11  ;;  %v1005_v28 = vstv %s1411_s20  ;;  %s1658_s20 = smov [#allocation10]  }
 0x1a7   : > { %1188 = vrot.lane.b32.xlu1 %v1183_v15, %s1656_s22  ;;  %996 = vrot.lane.b32.xlu0 %v992_v19, %s1657_s28  ;;  %s1390_s22 = sld [smem:[#allocation3 + $0x2a]]  ;;  %v1006_v26 = vmul.f32 %v1005_v28, %v2066_v9 }
 0x1a8   : > { %v663_v30 = vadd.f32 %v661_v25, %v657_v12 }
 0x1a9   : > { %v673_v32 = vpop.permute.xlu1 %672  ;;  %v685_v33 = vpop.permute.xlu0 %684 }
 0x1aa   : > { %v677_v17 = vadd.f32 %v673_v32, %v663_v30  ;;  %v690_v39 = vadd.f32 %v685_v33, %v676_v21 }
 0x1ab   : > { %998 = vrot.lane.b32.xlu1 %v993_v35, %s1657_s28  ;;  %1098 = vrot.lane.b32.xlu0 %v1094_v38, %s1657_s28  ;;  %v1007_v35 = vmul.f32 %v1005_v28, %v2082_v31  ;;  %v937_v28 = vstv %s1405_s6 }
 0x1ac   : > { %v2263_v43 = vadd.f32 %v904_v42, %v690_v39 }
 0x1ad   : > { %v687_v45 = vpop.permute.xlu1 %686  ;;  %v705_v6 = vpop.permute.xlu0 %704  ;;  %v761_v63 = vstv %s1390_s22  ;;  %s1573_s22 = scalar_lea.vmem %s2327_s26, 768 }
 0x1ae   : > { %v691_v50 = vadd.f32 %v687_v45, %v677_v17  ;;  %v710_v1 = vadd.f32 %v705_v6, %v2135_v22  ;;  %v763_v14 = vmul.f32 %v761_v63, %v1956_v34  ;;  %p1574_p3 = scmp.ne.s32.totalorder %s2327_s26, %s1573_s22 }
 0x1af   : > { %1100 = vrot.lane.b32.xlu1 %v1095_v46, %s1657_s28  ;;  %1200 = vrot.lane.b32.xlu0 %v1196_v49, %s1657_s28 }
 0x1b0   : > { %v2272_v53 = vadd.f32 %v905_v51, %v691_v50  ;;  %p1575_p8 = pnand %p1574_p3, %p2392_p0 }
 0x1b1   : > { %v707_v13 = vpop.permute.xlu1 %706  ;;  %v719_v55 = vpop.permute.xlu0 %718 }
 0x1b2   : > { %v711_v20 = vadd.f32 %v707_v13, %v2150_v40  ;;  %v724_v57 = vadd.f32 %v719_v55, %v710_v1  ;;  %v762_v40 = vmul.f32 %v761_v63, %v1950_v29  ;;  %v863_v13 = vstv %s1399_s27  ;;  %p1576_p10 = pneg %p1575_p8 }
 0x1b3   : > { %1202 = vrot.lane.b32.xlu1 %v1197_v56, %s1657_s28  ;;  %s1396_s28 = sld [smem:[#allocation3 + $0x42]] }
 0x1b4   : > { %v730_v22 = vadd.f32 %v728_v58, %v724_v57  ;;  %v864_v58 = vmul.f32 %v863_v13, %v1950_v29 }
 0x1b5   : > { %v721_v16 = vpop.permute.xlu1 %720  ;;  %v739_v59 = vpop.permute.xlu0 %738 }
 0x1b6   : > { %v725_v60 = vadd.f32 %v721_v16, %v711_v20  ;;  %v744_v61 = vadd.f32 %v739_v59, %v730_v22 }
 0x1b8   : > { %v731_v0 = vadd.f32 %v729_v62, %v725_v60  ;;  %v865_v60 = vmul.f32 %v863_v13, %v1956_v34 }
 0x1b9   : > { %v741_v24 = vpop.permute.xlu1 %740  ;;  %v753_v2 = vpop.permute.xlu0 %752  ;;  %v829_v38 = vstv %s1396_s28  ;;  %s1577_s28 = sshll.u32 %s1658_s20, 4  ;;  %s1578_s28 = int_to_ptr.vmem [resolvable:$false] %s1577_s28 }
 0x1ba   : > { %v745_v3 = vadd.f32 %v741_v24, %v731_v0  ;;  %v758_v4 = vadd.f32 %v753_v2, %v744_v61  ;;  %v830_v6 = vmul.f32 %v829_v38, %v1938_v18  ;;  %v831_v52 = vmul.f32 %v829_v38, %v1944_v23  ;;  %s1579_s27 = scalar_lea.vmem %s1578_s28, 1536  ;;  %p1580_p6 = scmp.lt.s32.totalorder %s2327_s26, %s1578_s28 }
 0x1bb   : > { %v1107_v61 = vstv %s1420_s5  ;;  %p1581_p12 = scmp.lt.s32.totalorder %s1579_s27, %s1573_s22 }
 0x1bc   : > { %v764_v5 = vadd.f32 %v762_v40, %v758_v4  ;;  %v1108_v2 = vmul.f32 %v1107_v61, %v2066_v9 }
 0x1bd   : > { %v755_v7 = vpop.permute.xlu1 %754  ;;  %v773_v8 = vpop.permute.xlu0 %772  ;;  %p1582_p7 = por %p1581_p12, %p1580_p6 }
 0x1be   : > { %v759_v10 = vadd.f32 %v755_v7, %v745_v3  ;;  %v778_v11 = vadd.f32 %v773_v8, %v764_v5  ;;  %v1109_v7 = vmul.f32 %v1107_v61, %v2082_v31 }
 0x1bf   : > { %p1583_p9 = pnand %p1582_p7, %p1576_p10 }
 0x1c0   : > { %v765_v15 = vadd.f32 %v763_v14, %v759_v10 }
 0x1c1   : > { %v775_v19 = vpop.permute.xlu1 %774  ;;  %v787_v12 = vpop.permute.xlu0 %786 }
 0x1c2   : > { %v779_v21 = vadd.f32 %v775_v19, %v765_v15  ;;  %v792_v25 = vadd.f32 %v787_v12, %v778_v11 }
 0x1c4   : > { %v1008_v27 = vadd.f32 %v1006_v26, %v792_v25  ;;  %v1039_v25 = vstv %s1414_s7 }
 0x1c5   : > { %v789_v30 = vpop.permute.xlu1 %788  ;;  %v807_v32 = vpop.permute.xlu0 %806 }
 0x1c6   : > { %v793_v33 = vadd.f32 %v789_v30, %v779_v21  ;;  %v812_v17 = vadd.f32 %v807_v32, %v2200_v37  ;;  %v938_v21 = vmul.f32 %v937_v28, %v2139_v36 }
 0x1c8   : > { %v2284_v39 = vadd.f32 %v1007_v35, %v793_v33 }
 0x1c9   : > { %v809_v41 = vpop.permute.xlu1 %808  ;;  %v821_v42 = vpop.permute.xlu0 %820 }
 0x1ca   : > { %v826_v45 = vadd.f32 %v821_v42, %v812_v17  ;;  %v813_v46 = vadd.f32 %v809_v41, %v2216_v47  ;;  %v939_v17 = vmul.f32 %v937_v28, %v2155_v48  ;;  %v1040_v41 = vmul.f32 %v1039_v25, %v2139_v36 }
 0x1cb   : > { %v1141_v42 = vstv %s2293_s8 }
 0x1cc   : > { %v832_v49 = vadd.f32 %v830_v6, %v826_v45 }
 0x1cd   : > { %v823_v50 = vpop.permute.xlu1 %822  ;;  %v841_v1 = vpop.permute.xlu0 %840 }
 0x1ce   : > { %v827_v51 = vadd.f32 %v823_v50, %v813_v46  ;;  %v846_v55 = vadd.f32 %v841_v1, %v832_v49 }
 0x1d0   : > { %v833_v56 = vadd.f32 %v831_v52, %v827_v51  ;;  %v1142_v51 = vmul.f32 %v1141_v42, %v2139_v36 }
 0x1d1   : > { %v843_v37 = vpop.permute.xlu1 %842  ;;  %v855_v20 = vpop.permute.xlu0 %854 }
 0x1d2   : > { %v860_v57 = vadd.f32 %v855_v20, %v846_v55  ;;  %v847_v22 = vadd.f32 %v843_v37, %v833_v56 }
 0x1d4   : > { %v866_v16 = vadd.f32 %v864_v58, %v860_v57  ;;  %v1143_v57 = vmul.f32 %v1141_v42, %v2155_v48 }
 0x1d5   : > { %v857_v18 = vpop.permute.xlu1 %856  ;;  %v875_v59 = vpop.permute.xlu0 %874 }
 0x1d6   : > { %v861_v47 = vadd.f32 %v857_v18, %v847_v22  ;;  %v880_v62 = vadd.f32 %v875_v59, %v866_v16  ;;  %v971_v59 = vstv %s1408_s9 }
 0x1d8   : > { %v867_v63 = vadd.f32 %v865_v60, %v861_v47 }
 0x1d9   : > { %v877_v23 = vpop.permute.xlu1 %876  ;;  %v889_v0 = vpop.permute.xlu0 %888 }
 0x1da   : > { %v894_v24 = vadd.f32 %v889_v0, %v880_v62  ;;  %v881_v3 = vadd.f32 %v877_v23, %v867_v63  ;;  %v972_v62 = vmul.f32 %v971_v59, %v2205_v44  ;;  %v1073_v63 = vstv %s1417_s11 }
 0x1dc   : > { %v1110_v4 = vadd.f32 %v1108_v2, %v894_v24 }
 0x1dd   : > { %v891_v40 = vpop.permute.xlu1 %890  ;;  %v915_v5 = vpop.permute.xlu0 %914 }
 0x1de   : > { %v895_v29 = vadd.f32 %v891_v40, %v881_v3  ;;  %v920_v9 = vadd.f32 %v915_v5, %v2263_v43  ;;  %v973_v40 = vmul.f32 %v971_v59, %v2222_v54  ;;  %v1074_v5 = vmul.f32 %v1073_v63, %v2205_v44 }
 0x1e0   : > { %v1111_v8 = vadd.f32 %v1109_v7, %v895_v29  ;;  %v1175_v29 = vstv %s2305_s4 }
 0x1e1   : > { %v917_v10 = vpop.permute.xlu1 %916  ;;  %v1017_v11 = vpop.permute.xlu0 %1016 }
 0x1e2   : > { %v921_v31 = vadd.f32 %v917_v10, %v2272_v53  ;;  %v1022_v26 = vadd.f32 %v1017_v11, %v1008_v27  ;;  %v1041_v27 = vmul.f32 %v1039_v25, %v2155_v48 }
 0x1e5   : > { %v1019_v34 = vpop.permute.xlu1 %1018  ;;  %v1119_v14 = vpop.permute.xlu0 %1118 }
 0x1e6   : > { %v1023_v43 = vadd.f32 %v1019_v34, %v2284_v39  ;;  %v1124_v45 = vadd.f32 %v1119_v14, %v1110_v4 }
 0x1e9   : > { %v1121_v15 = vpop.permute.xlu1 %1120  ;;  %v929_v19 = vpop.permute.xlu0 %928 }
 0x1ea   : > { %v934_v12 = vadd.f32 %v929_v19, %v920_v9  ;;  %v1125_v52 = vadd.f32 %v1121_v15, %v1111_v8  ;;  %v1075_v15 = vmul.f32 %v1073_v63, %v2222_v54  ;;  %v1176_v19 = vmul.f32 %v1175_v29, %v2205_v44 }
 0x1ec   : > { %v940_v30 = vadd.f32 %v938_v21, %v934_v12 }
 0x1ed   : > { %v931_v32 = vpop.permute.xlu1 %930  ;;  %v1031_v33 = vpop.permute.xlu0 %1030 }
 0x1ee   : > { %v935_v35 = vadd.f32 %v931_v32, %v921_v31  ;;  %v1036_v38 = vadd.f32 %v1031_v33, %v1022_v26  ;;  %v1177_v32 = vmul.f32 %v1175_v29, %v2222_v54 }
 0x1f0   : > { %v941_v6 = vadd.f32 %v939_v17, %v935_v35  ;;  %v1042_v46 = vadd.f32 %v1040_v41, %v1036_v38 }
 0x1f1   : > { %v1033_v49 = vpop.permute.xlu1 %1032  ;;  %v1133_v50 = vpop.permute.xlu0 %1132 }
 0x1f2   : > { %v1037_v1 = vadd.f32 %v1033_v49, %v1023_v43  ;;  %v1138_v53 = vadd.f32 %v1133_v50, %v1124_v45 }
 0x1f4   : > { %v1043_v13 = vadd.f32 %v1041_v27, %v1037_v1  ;;  %v1144_v55 = vadd.f32 %v1142_v51, %v1138_v53 }
 0x1f5   : > { %v1135_v56 = vpop.permute.xlu1 %1134  ;;  %v949_v37 = vpop.permute.xlu0 %948 }
 0x1f6   : > { %v1139_v20 = vadd.f32 %v1135_v56, %v1125_v52  ;;  %v954_v36 = vadd.f32 %v949_v37, %v940_v30 }
 0x1f8   : > { %v1145_v39 = vadd.f32 %v1143_v57, %v1139_v20 }
 0x1f9   : > { %v951_v58 = vpop.permute.xlu1 %950  ;;  %v1051_v22 = vpop.permute.xlu0 %1050 }
 0x1fa   : > { %v955_v23 = vadd.f32 %v951_v58, %v941_v6  ;;  %v1056_v48 = vadd.f32 %v1051_v22, %v1042_v46 }
 0x1fd   : > { %v1053_v16 = vpop.permute.xlu1 %1052  ;;  %v1153_v18 = vpop.permute.xlu0 %1152 }
 0x1fe   : > { %v1057_v7 = vadd.f32 %v1053_v16, %v1043_v13  ;;  %v1158_v8 = vadd.f32 %v1153_v18, %v1144_v55 }
 0x201   : > { %v1155_v47 = vpop.permute.xlu1 %1154  ;;  %v963_v60 = vpop.permute.xlu0 %962 }
 0x202   : > { %v968_v61 = vadd.f32 %v963_v60, %v954_v36  ;;  %v1159_v12 = vadd.f32 %v1155_v47, %v1145_v39 }
 0x204   : > { %v974_v0 = vadd.f32 %v972_v62, %v968_v61 }
 0x205   : > { %v965_v24 = vpop.permute.xlu1 %964  ;;  %v1065_v2 = vpop.permute.xlu0 %1064 }
 0x206   : > { %v969_v3 = vadd.f32 %v965_v24, %v955_v23  ;;  %v1070_v4 = vadd.f32 %v1065_v2, %v1056_v48 }
 0x208   : > { %v975_v10 = vadd.f32 %v973_v40, %v969_v3  ;;  %v1076_v11 = vadd.f32 %v1074_v5, %v1070_v4 }
 0x209   : > { %v1067_v34 = vpop.permute.xlu1 %1066  ;;  %v1167_v14 = vpop.permute.xlu0 %1166 }
 0x20a   : > { %v1071_v28 = vadd.f32 %v1067_v34, %v1057_v7  ;;  %v1172_v9 = vadd.f32 %v1167_v14, %v1158_v8 }
 0x20c   : > { %v1077_v21 = vadd.f32 %v1075_v15, %v1071_v28  ;;  %v1178_v25 = vadd.f32 %v1176_v19, %v1172_v9 }
 0x20d   : > { %v1169_v31 = vpop.permute.xlu1 %1168  ;;  %v983_v26 = vpop.permute.xlu0 %982 }
 0x20e   : > { %v1173_v30 = vadd.f32 %v1169_v31, %v1159_v12  ;;  %v988_v42 = vadd.f32 %v983_v26, %v974_v0 }
 0x210   : > { %v1179_v33 = vadd.f32 %v1177_v32, %v1173_v30 }
 0x211   : > { %v985_v35 = vpop.permute.xlu1 %984  ;;  %v1085_v38 = vpop.permute.xlu0 %1084 }
 0x212   : > { %v989_v44 = vadd.f32 %v985_v35, %v975_v10  ;;  %v1090_v46 = vadd.f32 %v1085_v38, %v1076_v11 }
 0x215   : > { %v1087_v17 = vpop.permute.xlu1 %1086  ;;  %v1187_v41 = vpop.permute.xlu0 %1186 }
 0x216   : > { %v1091_v27 = vadd.f32 %v1087_v17, %v1077_v21  ;;  %v1192_v51 = vadd.f32 %v1187_v41, %v1178_v25 }
 0x219   : > { %v1189_v43 = vpop.permute.xlu1 %1188  ;;  %v997_v45 = vpop.permute.xlu0 %996 }
 0x21a   : > { %v1002_v6 = vadd.f32 %v997_v45, %v988_v42  ;;  %v1193_v57 = vadd.f32 %v1189_v43, %v1179_v33 }
 0x21c   : > { %v1208_v49 = vmax.f32 %v1002_v6, 0.0 }
 0x21d   : > { %v999_v50 = vpop.permute.xlu1 %998  ;;  %v1099_v1 = vpop.permute.xlu0 %1098 }
 0x21e   : > { %1215 = vst.msk [vmem:[%s213_s10] sm:$0xff] %vm1214_vm3, %v1208_v49  ;;  %v1003_v54 = vadd.f32 %v999_v50, %v989_v44  ;;  %v1104_v53 = vadd.f32 %v1099_v1, %v1090_v46 }
 0x220   : > { %v1209_v52 = vmax.f32 %v1003_v54, 0.0  ;;  %v1210_v13 = vmax.f32 %v1104_v53, 0.0 }
 0x221   : > { %v1101_v55 = vpop.permute.xlu1 %1100  ;;  %v1201_v56 = vpop.permute.xlu0 %1200 }
 0x222   : > { %1216 = vst.msk [vmem:[%s213_s10 + $0x8] sm:$0xff] %vm1214_vm3, %v1209_v52  ;;  %1429 = vst.msk [vmem:[%s213_s10 + $0x10] sm:$0xff] %vm1214_vm3, %v1210_v13  ;;  %v1105_v37 = vadd.f32 %v1101_v55, %v1091_v27  ;;  %v1206_v20 = vadd.f32 %v1201_v56, %v1192_v51 }
 0x224   : > { %v1211_v39 = vmax.f32 %v1105_v37, 0.0  ;;  %v1212_v58 = vmax.f32 %v1206_v20, 0.0 }
 0x225   : > { %v1203_v22 = vpop.permute.xlu1 %1202 }
 0x226   : > { %1430 = vst.msk [vmem:[%s213_s10 + $0x18] sm:$0xff] %vm1214_vm3, %v1211_v39  ;;  %1431 = vst.msk [vmem:[%s213_s10 + $0x20] sm:$0xff] %vm1214_vm3, %v1212_v58  ;;  %v1207_v16 = vadd.f32 %v1203_v22, %v1193_v57 }
 0x228   : > { %v1213_v18 = vmax.f32 %v1207_v16, 0.0 }
 0x22a   : > { %1432 = vst.msk [vmem:[%s213_s10 + $0x28] sm:$0xff] %vm1214_vm3, %v1213_v18 }
 0x22b   : > { %1586 = shalt.err (!%p1583_p9)
}
 0x22c   : > { %s1587_s5 = scalar_lea.hbm %s2325_s29, 768  ;;  %s1591_s8 = scalar_lea.hbm %s2375_s3, 1536 }
 0x22d   : > { %p1588_p2 = scmp.ne.s32.totalorder %s2325_s29, %s1587_s5  ;;  %p1592_p4 = scmp.lt.u32.totalorder %s2325_s29, %s2375_s3 }
 0x22e   : > { %p1593_p5 = scmp.lt.u32.totalorder %s1591_s8, %s1587_s5  ;;  %p1595_p3 = scmp.lt.u32.totalorder %s1587_s5, %s2325_s29 }
 0x22f   : > { %p1589_p11 = pnand %p1588_p2, %p2392_p0 }
 0x230   : > { %p1594_p13 = por %p1593_p5, %p1592_p4 }
 0x231   : > { %p1590_p1 = pneg %p1589_p11 }
 0x232   : > { %p1596_p8 = por %p1595_p3, %p1594_p13 }
 0x234   : > { %p1597_p10 = pnand %p1596_p8, %p1590_p1 }
 0x236   : > { %1600 = shalt.err (!%p1597_p10)
}
 0x237   : > { %s1659_s4 = smov 128   ;;  %s1660_s10 = smov 8  }
 0x238   : > { %1450 = dma.vmem_to_hbm [thread:$0]  (%p2392_p0), %s2327_s26, 768, %s2325_s29, %s1224_s16, %s1659_s4, %s1659_s4, %s1660_s10  }
 0x239 PF: > { %s1252_s17 = sand.u32 1, %s1635_s12   ;;  %p2393_p6 = scmp.ne.s32.totalorder %s2382_s25, 0 }
 0x23a   : > { %p2394_p12 = scmp.ge.s32.totalorder %s1647_s15, 2  ;;  %s1253_s23 = scalar_lea.sflag [#allocation5], %s1252_s17 }
 0x23c   : > { %p1464_p7 = pnand %p2394_p12, %p2393_p6 }
 0x23e   : > { %1630 = dma.done.wait (!%p1464_p7), %s1253_s23, 768  }
 0x23f   : > { %1632 = vsyncadd (!%p1464_p7), %s1253_s23, 4294966528  ;;  %p18_p9 = scmp.ge.s32.totalorder %s1706_s18, 4   ;;  %s2395_s12 = smov %s1639_s13 }
 0x240   : > { %s2396_s13 = smov %s1643_s14  ;;  %s2397_s14 = smov %s1718_s21 }
 0x241   : > { %s2398_s15 = smov %s1706_s18  ;;  %20 = sbr.rel (!%p18_p9) target bundleno = 7 (0x7), region = 93 }
 0x248   :  { %1258 = vsyncpa [#allocation4], 1 }
 0x249   :  { %1260 = vsyncpa [#allocation4 + $0x1], 1 }
 0x24a   :  { %1261 = vsyncpa [#allocation5], 1 }
 0x24b   :  { %1263 = vsyncpa [#allocation5 + $0x1], 1 }
 0x24c   :  { %1264 = vsyncpa [#allocation6], 1 }
 0x24d   :  { %1266 = vsyncpa [#allocation6 + $0x1], 1 }
 0x24e   :  { %1267 = vsyncpa [#allocation7], 1 }
 0x24f   :  { %1269 = vsyncpa [#allocation7 + $0x1], 1 }

</bundles_post_ra>
